<compile_context>
chip_gen: v7x
topology: tpu7x:2x2x1
jax: 0.10.0
libtpu: 0.0.40
codegen_flags: <defaults>
</compile_context>

<pallas_src>
import math
import numpy as np
import jax
import jax.numpy as jnp
from jax.experimental import pallas as pl
from jax.experimental.pallas import tpu as pltpu


# ----------------------------------------------------------------------------
# Tree architecture (the reference file leaves tree_arch empty; these are the
# canonical TopNet architectures).
# ----------------------------------------------------------------------------
tree_arch = {
    2: [32, 64],
    4: [4, 8, 8, 8],
    6: [2, 4, 4, 4, 4, 4],
    8: [2, 2, 2, 2, 2, 4, 4, 4],
}


def get_arch(nlevels, num_output_points):
    """Mirror of topnet.get_arch (numpy semantics preserved)."""
    logmult = int(math.log2(num_output_points / 2048))
    tarch = np.array(tree_arch[nlevels], dtype=np.int64)
    if num_output_points == 16384:
        while logmult > 0:
            last_min_pos = np.where(tarch == np.min(tarch))[0][-1]
            tarch[last_min_pos] *= 2
            logmult -= 1
    num_nodes = []
    for i, up_ratio in enumerate(tarch):
        if i == 0:
            num_nodes.append(int(up_ratio))
        else:
            num_nodes.append(int(up_ratio) * num_nodes[-1])
    return tarch, num_nodes


# ----------------------------------------------------------------------------
# Parameter construction (deterministic, PyTorch-nn.Linear-style init).
# Weights stored (in_features, out_features) so every layer is  h @ W + b.
# ----------------------------------------------------------------------------
def _init_linear(key, fan_in, fan_out):
    kw, kb = jax.random.split(key)
    bound = 1.0 / math.sqrt(fan_in)
    w = jax.random.uniform(kw, (fan_in, fan_out), jnp.float32, -bound, bound)
    b = jax.random.uniform(kb, (fan_out,), jnp.float32, -bound, bound)
    return w, b


def make_topnet_params(key, z_dim, nlevels, node_feat_dim, num_output_points):
    tarch, num_nodes = get_arch(nlevels, num_output_points)
    input_code_dim = z_dim + node_feat_dim

    params = {"tarch": tarch, "num_nodes": num_nodes,
              "z_dim": z_dim, "node_feat_dim": node_feat_dim}

    # fc1: z_dim -> 256 -> 64 -> node_feat_dim * tarch[0]   (ReLU, ReLU, Tanh)
    dims = [z_dim, 256, 64, node_feat_dim * int(tarch[0])]
    fc1 = []
    for i in range(3):
        key, sub = jax.random.split(key)
        fc1.append(_init_linear(sub, dims[i], dims[i + 1]))
    params["fc1"] = fc1

    # upconv for levels 1 .. nlevels-1
    upconvs = []
    for level in range(1, nlevels):
        up_ratio = int(tarch[level])
        d = [input_code_dim,
             int(input_code_dim / 2),
             int(input_code_dim / 4),
             int(input_code_dim / 8),
             node_feat_dim * up_ratio]
        layers = []
        for i in range(4):
            key, sub = jax.random.split(key)
            layers.append(_init_linear(sub, d[i], d[i + 1]))
        upconvs.append(layers)
    params["upconvs"] = upconvs

    # last_mlp: node_feat_dim -> 3, Tanh
    key, sub = jax.random.split(key)
    params["last"] = [_init_linear(sub, node_feat_dim, 3)]
    return params


# ----------------------------------------------------------------------------
# Weight slab packer: every Linear is stored transposed, (d_out, d_in), with
# its bias appended as the last column, at an 8-aligned row offset inside one
# f32 slab (cols padded to a multiple of 128).  One resident input instead of
# ~44 tiny specs.
# ----------------------------------------------------------------------------
def _pack_params(params):
    layers = []
    for w, b in params["fc1"]:
        layers.append((w, b))
    for lvl in params["upconvs"]:
        for w, b in lvl:
            layers.append((w, b))
    layers.append(params["last"][0])

    metas = []      # (row_offset, d_out, d_in) per layer (static python ints)
    blocks = []
    row = 0
    max_cols = 0
    for w, b in layers:
        d_in, d_out = int(w.shape[0]), int(w.shape[1])
        aug = jnp.concatenate(
            [jnp.asarray(w, jnp.float32).T,
             jnp.asarray(b, jnp.float32).reshape(-1, 1)], axis=1)  # (d_out, d_in+1)
        metas.append((row, d_out, d_in))
        blocks.append((row, aug))
        row += -(-d_out // 8) * 8
        max_cols = max(max_cols, d_in + 1)

    rows_pad = -(-row // 8) * 8
    cols_pad = -(-max_cols // 128) * 128
    slab = jnp.zeros((rows_pad, cols_pad), jnp.float32)
    for off, aug in blocks:
        slab = slab.at[off:off + aug.shape[0], :aug.shape[1]].set(aug)
    return slab, metas


def _tile_lanes(x, reps):
    """Concatenate `reps` copies of x along the lane axis (log-depth)."""
    if reps == 1:
        return x
    out = x
    built = 1
    while built * 2 <= reps:
        out = jnp.concatenate([out, out], axis=1)
        built *= 2
    if built < reps:
        out = jnp.concatenate([out, _tile_lanes(x, reps - built)], axis=1)
    return out


# ----------------------------------------------------------------------------
# Fully-fused TopNet kernel: one grid step = TB batch elements, all levels.
# Activations are (features, nodes*TB); weights are read from one VMEM slab.
# ----------------------------------------------------------------------------
def _build_fused_kernel(metas, z_dim, feat_dim, t0, ratios, TB):
    F = feat_dim
    n_up = len(ratios)
    m_fc1 = metas[0:3]
    m_up = [metas[3 + 4 * l: 3 + 4 * (l + 1)] for l in range(n_up)]
    m_last = metas[3 + 4 * n_up]

    def lin(w_ref, meta, x):
        r0, dout, din = meta
        blk = w_ref[r0:r0 + dout, 0:din + 1]          # (d_out, d_in+1)
        y = jnp.dot(blk[:, :din], x, preferred_element_type=jnp.float32)
        return y + blk[:, din:din + 1]                # bias broadcasts over lanes

    def kernel(z_ref, w_ref, out_ref):
        z = z_ref[0]                                   # (z_dim, TB)

        # ---- fc1: z -> 256 -> 64 -> t0*F  (ReLU, ReLU, Tanh) ----
        h = jnp.maximum(lin(w_ref, m_fc1[0], z), 0.0)
        h = jnp.maximum(lin(w_ref, m_fc1[1], h), 0.0)
        h = jnp.tanh(lin(w_ref, m_fc1[2], h))          # (t0*F, TB)
        # root nodes along lanes: lane = n0*TB + b   (aligned 8-sublane slices)
        node = jnp.concatenate([h[n0 * F:(n0 + 1) * F, :] for n0 in range(t0)],
                               axis=1)                 # (F, t0*TB)

        n_cur = t0
        # ---- upconv levels; z-concat replaced by split-weight broadcast ----
        for lvl in range(n_up):
            meta1, meta2, meta3, meta4 = m_up[lvl]
            r0, d1, din1 = meta1                       # din1 = z_dim + F
            blk1 = w_ref[r0:r0 + d1, 0:din1 + 1]
            wz = blk1[:, :z_dim]
            wn = blk1[:, z_dim:z_dim + F]
            b1 = blk1[:, din1:din1 + 1]
            zp = jnp.dot(wz, z, preferred_element_type=jnp.float32) + b1  # (d1, TB)
            if TB == 1:
                zb = zp                                # (d1,1) broadcasts over lanes
            else:
                zb = _tile_lanes(zp, n_cur)            # (d1, n_cur*TB), b innermost
            hh = jnp.maximum(
                jnp.dot(wn, node, preferred_element_type=jnp.float32) + zb, 0.0)
            hh = jnp.maximum(lin(w_ref, meta2, hh), 0.0)
            hh = jnp.maximum(lin(w_ref, meta3, hh), 0.0)
            packed = jnp.tanh(lin(w_ref, meta4, hh))   # (R*F, n_cur*TB)
            R = ratios[lvl]
            # child-major re-pack: lane = r*(n_cur*TB) + old_lane
            node = jnp.concatenate(
                [packed[r * F:(r + 1) * F, :] for r in range(R)], axis=1)
            n_cur *= R                                 # (F, n_cur*TB)

        # ---- last_mlp: dense (3, F) matmul, lane-dense (3, N*TB) store ----
        out = jnp.tanh(lin(w_ref, m_last, node))       # (3, N*TB)
        out_ref[0] = out.astype(out_ref.dtype)

    return kernel


def topnet_forward_pallas(params, z, *, batch_block=None):
    tarch = params["tarch"]
    num_nodes = params["num_nodes"]
    nlevels = len(num_nodes)
    assert nlevels >= 2, "topnet needs at least one upconv level"
    F = params["node_feat_dim"]
    z_dim = params["z_dim"]
    t0 = int(tarch[0])
    ratios = [int(tarch[l]) for l in range(1, nlevels)]
    n_up = len(ratios)
    N = num_nodes[-1]
    B = z.shape[0]

    # Batch blocking: TB codes per grid step; keep >=2 grid steps when B>=2
    # so both v7x TensorCores get work (no-op on v5e/v6e).
    if batch_block is None:
        TB = 1 if B <= 1 else min(8, max(1, B // 2))
    else:
        TB = int(batch_block)
    G = -(-B // TB)
    B_pad = G * TB

    zf = jnp.asarray(z, jnp.float32)
    if B_pad != B:
        zf = jnp.concatenate(
            [zf, jnp.zeros((B_pad - B, z_dim), jnp.float32)], axis=0)
    # (G, z_dim, TB): one transposed block of TB latent codes per grid step.
    z_blocks = zf.reshape(G, TB, z_dim).transpose(0, 2, 1)

    slab, metas = _pack_params(params)
    kernel = _build_fused_kernel(metas, z_dim, F, t0, ratios, TB)

    lanes = N * TB
    out_store = pl.pallas_call(
        kernel,
        out_shape=jax.ShapeDtypeStruct((G, 3, lanes), jnp.float32),
        grid=(G,),
        in_specs=[pl.BlockSpec((1, z_dim, TB), lambda g: (g, 0, 0)),
                  pl.BlockSpec(slab.shape, lambda g: (0, 0))],   # resident weights
        out_specs=pl.BlockSpec((1, 3, lanes), lambda g: (g, 0, 0)),
        compiler_params=pltpu.CompilerParams(
            dimension_semantics=("parallel",)),
    )(z_blocks, slab)

    # Un-permute from the kernel's child-major lane order back to the
    # reference point ordering:
    #   stored lanes  (R_{L-1}, ..., R_1, t0, TB)   (b innermost)
    #   natural       (t0, R_1, ..., R_{L-1})
    stored = [ratios[l] for l in range(n_up - 1, -1, -1)] + [t0, TB]
    pc = out_store.reshape((G, 3, *stored))
    perm = (0, n_up + 3, n_up + 2) + tuple(range(n_up + 1, 1, -1)) + (1,)
    pc = jnp.transpose(pc, perm).reshape(B_pad, N, 3)
    return pc[:B]


# ----------------------------------------------------------------------------
# Pure-JAX reference (mirrors the PyTorch forward exactly).
# ----------------------------------------------------------------------------
def topnet_forward_ref(params, z):
    B = z.shape[0]
    tarch = params["tarch"]
    F = params["node_feat_dim"]

    def mlp(x, layers, acts):
        h = x
        for (w, b), a in zip(layers, acts):
            h = h @ w + b
            if a == "relu":
                h = jnp.maximum(h, 0.0)
            elif a == "tanh":
                h = jnp.tanh(h)
        return h

    node = mlp(z, params["fc1"], ["relu", "relu", "tanh"])
    node = node.reshape(-1, int(tarch[0]), F)
    for layers in params["upconvs"]:
        n = node.shape[1]
        z_t = jnp.broadcast_to(z[:, None, :], (B, n, z.shape[1]))
        x = jnp.concatenate((z_t, node), axis=2)
        out = mlp(x.reshape(B * n, -1), layers, ["relu", "relu", "relu", "tanh"])
        node = out.reshape(B, -1, F)
    pc = mlp(node.reshape(B * node.shape[1], F), params["last"], ["tanh"])
    return pc.reshape(B, -1, 3)


# ----------------------------------------------------------------------------
if __name__ == "__main__":
    # 4 levels, tarch = [4, 8, 8, 8] -> 2048 points per cloud.
    z_dim = 32
    nlevels = 4
    node_feat_dim = 8
    num_output_points = 2048
    batch = 2

    key = jax.random.PRNGKey(0)
    kp, kz, kz2 = jax.random.split(key, 3)
    params = make_topnet_params(kp, z_dim, nlevels, node_feat_dim,
                                num_output_points)
    z = jax.random.normal(kz, (batch, z_dim), dtype=jnp.float32)

    fwd = jax.jit(lambda zz: topnet_forward_pallas(params, zz))
    pc = jax.block_until_ready(fwd(z))

    expected_points = params["num_nodes"][-1]
    assert pc.shape == (batch, expected_points, 3), pc.shape

    with jax.default_matmul_precision("highest"):
        pc_ref = jax.block_until_ready(topnet_forward_ref(params, z))
    err = float(np.max(np.abs(np.asarray(pc) - np.asarray(pc_ref))))
    assert np.allclose(np.asarray(pc), np.asarray(pc_ref),
                       atol=3e-5, rtol=3e-5), err

    # Second check: uneven batch with TB>1 exercises the batch-blocking /
    # lane-tiling + padding paths.
    batch2 = 5
    z2 = jax.random.normal(kz2, (batch2, z_dim), dtype=jnp.float32)
    fwd2 = jax.jit(lambda zz: topnet_forward_pallas(params, zz, batch_block=2))
    pc2 = jax.block_until_ready(fwd2(z2))
    assert pc2.shape == (batch2, expected_points, 3), pc2.shape
    with jax.default_matmul_precision("highest"):
        pc2_ref = jax.block_until_ready(topnet_forward_ref(params, z2))
    err2 = float(np.max(np.abs(np.asarray(pc2) - np.asarray(pc2_ref))))
    assert np.allclose(np.asarray(pc2), np.asarray(pc2_ref),
                       atol=3e-5, rtol=3e-5), err2

    print("KERNEL_OK")
</pallas_src>

<mosaic_0001>
module attributes {stable_mosaic.version = 11 : i64} {
  func.func @kernel(%arg0: i32, %arg1: memref<1x32x1xf32, #tpu.memory_space<vmem>>, %arg2: memref<696x384xf32, #tpu.memory_space<vmem>>, %arg3: memref<1x3x2048xf32, #tpu.memory_space<vmem>>) attributes {dimension_semantics = [#tpu.dimension_semantics<parallel>], iteration_bounds = array<i64: 2>, scalar_prefetch = 0 : i64, scratch_operands = 0 : i64, tpu.core_type = #tpu.core_type<tc>, window_params = [{transform_indices = @transform_0, window_bounds = array<i64: 1, 32, 1>}, {pipeline_mode = #tpu.pipeline_mode<synchronous>, transform_indices = @transform_1, window_bounds = array<i64: 696, 384>}, {transform_indices = @transform_2, window_bounds = array<i64: 1, 3, 2048>}]} {
    %c0 = arith.constant 0 : index
    %c0_0 = arith.constant 0 : index
    %c0_1 = arith.constant 0 : index
    %0 = vector.load %arg1[%c0, %c0_0, %c0_1] : memref<1x32x1xf32, #tpu.memory_space<vmem>>, vector<1x32x1xf32>
    %1 = vector.shape_cast %0 : vector<1x32x1xf32> to vector<32x1xf32>
    %c0_2 = arith.constant 0 : index
    %c0_3 = arith.constant 0 : index
    %2 = vector.load %arg2[%c0_2, %c0_3] : memref<696x384xf32, #tpu.memory_space<vmem>>, vector<256x33xf32>
    %3 = vector.extract_strided_slice %2 {offsets = [0, 0], sizes = [256, 32], strides = [1, 1]} : vector<256x33xf32> to vector<256x32xf32>
    %cst = arith.constant dense<0.000000e+00> : vector<256x1xf32>
    %4 = tpu.matmul %3, %1, %cst {dimension_numbers = #tpu.dot_dimension_numbers<[1], [0], [0], [1], [0, 0, 1, 1], [], []>} : vector<256x32xf32>, vector<32x1xf32>, vector<256x1xf32> -> vector<256x1xf32>
    %5 = vector.extract_strided_slice %2 {offsets = [0, 32], sizes = [256, 1], strides = [1, 1]} : vector<256x33xf32> to vector<256x1xf32>
    %6 = arith.addf %4, %5 : vector<256x1xf32>
    %cst_4 = arith.constant 0.000000e+00 : f32
    %7 = vector.broadcast %cst_4 : f32 to vector<256x1xf32>
    %8 = arith.maximumf %6, %7 : vector<256x1xf32>
    %c256 = arith.constant 256 : index
    %c0_5 = arith.constant 0 : index
    %9 = vector.load %arg2[%c256, %c0_5] : memref<696x384xf32, #tpu.memory_space<vmem>>, vector<64x257xf32>
    %10 = vector.extract_strided_slice %9 {offsets = [0, 0], sizes = [64, 256], strides = [1, 1]} : vector<64x257xf32> to vector<64x256xf32>
    %cst_6 = arith.constant dense<0.000000e+00> : vector<64x1xf32>
    %11 = tpu.matmul %10, %8, %cst_6 {dimension_numbers = #tpu.dot_dimension_numbers<[1], [0], [0], [1], [0, 0, 1, 1], [], []>} : vector<64x256xf32>, vector<256x1xf32>, vector<64x1xf32> -> vector<64x1xf32>
    %12 = vector.extract_strided_slice %9 {offsets = [0, 256], sizes = [64, 1], strides = [1, 1]} : vector<64x257xf32> to vector<64x1xf32>
    %13 = arith.addf %11, %12 : vector<64x1xf32>
    %cst_7 = arith.constant 0.000000e+00 : f32
    %14 = vector.broadcast %cst_7 : f32 to vector<64x1xf32>
    %15 = arith.maximumf %13, %14 : vector<64x1xf32>
    %c320 = arith.constant 320 : index
    %c0_8 = arith.constant 0 : index
    %16 = vector.load %arg2[%c320, %c0_8] : memref<696x384xf32, #tpu.memory_space<vmem>>, vector<32x65xf32>
    %17 = vector.extract_strided_slice %16 {offsets = [0, 0], sizes = [32, 64], strides = [1, 1]} : vector<32x65xf32> to vector<32x64xf32>
    %cst_9 = arith.constant dense<0.000000e+00> : vector<32x1xf32>
    %18 = tpu.matmul %17, %15, %cst_9 {dimension_numbers = #tpu.dot_dimension_numbers<[1], [0], [0], [1], [0, 0, 1, 1], [], []>} : vector<32x64xf32>, vector<64x1xf32>, vector<32x1xf32> -> vector<32x1xf32>
    %19 = vector.extract_strided_slice %16 {offsets = [0, 64], sizes = [32, 1], strides = [1, 1]} : vector<32x65xf32> to vector<32x1xf32>
    %20 = arith.addf %18, %19 : vector<32x1xf32>
    %21 = math.tanh %20 : vector<32x1xf32>
    %22 = vector.extract_strided_slice %21 {offsets = [0, 0], sizes = [8, 1], strides = [1, 1]} : vector<32x1xf32> to vector<8x1xf32>
    %23 = vector.extract_strided_slice %21 {offsets = [8, 0], sizes = [8, 1], strides = [1, 1]} : vector<32x1xf32> to vector<8x1xf32>
    %24 = vector.extract_strided_slice %21 {offsets = [16, 0], sizes = [8, 1], strides = [1, 1]} : vector<32x1xf32> to vector<8x1xf32>
    %25 = vector.extract_strided_slice %21 {offsets = [24, 0], sizes = [8, 1], strides = [1, 1]} : vector<32x1xf32> to vector<8x1xf32>
    %26 = tpu.concatenate %22, %23, %24, %25 in 1 : vector<8x1xf32>, vector<8x1xf32>, vector<8x1xf32>, vector<8x1xf32> -> vector<8x4xf32>
    %c352 = arith.constant 352 : index
    %c0_10 = arith.constant 0 : index
    %27 = vector.load %arg2[%c352, %c0_10] : memref<696x384xf32, #tpu.memory_space<vmem>>, vector<20x41xf32>
    %28 = vector.extract_strided_slice %27 {offsets = [0, 0], sizes = [20, 32], strides = [1, 1]} : vector<20x41xf32> to vector<20x32xf32>
    %29 = vector.extract_strided_slice %27 {offsets = [0, 32], sizes = [20, 8], strides = [1, 1]} : vector<20x41xf32> to vector<20x8xf32>
    %30 = vector.extract_strided_slice %27 {offsets = [0, 40], sizes = [20, 1], strides = [1, 1]} : vector<20x41xf32> to vector<20x1xf32>
    %cst_11 = arith.constant dense<0.000000e+00> : vector<20x1xf32>
    %31 = tpu.matmul %28, %1, %cst_11 {dimension_numbers = #tpu.dot_dimension_numbers<[1], [0], [0], [1], [0, 0, 1, 1], [], []>} : vector<20x32xf32>, vector<32x1xf32>, vector<20x1xf32> -> vector<20x1xf32>
    %32 = arith.addf %31, %30 : vector<20x1xf32>
    %cst_12 = arith.constant dense<0.000000e+00> : vector<20x4xf32>
    %33 = tpu.matmul %29, %26, %cst_12 {dimension_numbers = #tpu.dot_dimension_numbers<[1], [0], [0], [1], [0, 0, 1, 1], [], []>} : vector<20x8xf32>, vector<8x4xf32>, vector<20x4xf32> -> vector<20x4xf32>
    %34 = vector.broadcast %32 : vector<20x1xf32> to vector<20x4xf32>
    %35 = arith.addf %33, %34 : vector<20x4xf32>
    %cst_13 = arith.constant 0.000000e+00 : f32
    %36 = vector.broadcast %cst_13 : f32 to vector<20x4xf32>
    %37 = arith.maximumf %35, %36 : vector<20x4xf32>
    %c376 = arith.constant 376 : index
    %c0_14 = arith.constant 0 : index
    %38 = vector.load %arg2[%c376, %c0_14] : memref<696x384xf32, #tpu.memory_space<vmem>>, vector<10x21xf32>
    %39 = vector.extract_strided_slice %38 {offsets = [0, 0], sizes = [10, 20], strides = [1, 1]} : vector<10x21xf32> to vector<10x20xf32>
    %cst_15 = arith.constant dense<0.000000e+00> : vector<10x4xf32>
    %40 = tpu.matmul %39, %37, %cst_15 {dimension_numbers = #tpu.dot_dimension_numbers<[1], [0], [0], [1], [0, 0, 1, 1], [], []>} : vector<10x20xf32>, vector<20x4xf32>, vector<10x4xf32> -> vector<10x4xf32>
    %41 = vector.extract_strided_slice %38 {offsets = [0, 20], sizes = [10, 1], strides = [1, 1]} : vector<10x21xf32> to vector<10x1xf32>
    %42 = vector.broadcast %41 : vector<10x1xf32> to vector<10x4xf32>
    %43 = arith.addf %40, %42 : vector<10x4xf32>
    %cst_16 = arith.constant 0.000000e+00 : f32
    %44 = vector.broadcast %cst_16 : f32 to vector<10x4xf32>
    %45 = arith.maximumf %43, %44 : vector<10x4xf32>
    %c392 = arith.constant 392 : index
    %c0_17 = arith.constant 0 : index
    %46 = vector.load %arg2[%c392, %c0_17] : memref<696x384xf32, #tpu.memory_space<vmem>>, vector<5x11xf32>
    %47 = vector.extract_strided_slice %46 {offsets = [0, 0], sizes = [5, 10], strides = [1, 1]} : vector<5x11xf32> to vector<5x10xf32>
    %cst_18 = arith.constant dense<0.000000e+00> : vector<5x4xf32>
    %48 = tpu.matmul %47, %45, %cst_18 {dimension_numbers = #tpu.dot_dimension_numbers<[1], [0], [0], [1], [0, 0, 1, 1], [], []>} : vector<5x10xf32>, vector<10x4xf32>, vector<5x4xf32> -> vector<5x4xf32>
    %49 = vector.extract_strided_slice %46 {offsets = [0, 10], sizes = [5, 1], strides = [1, 1]} : vector<5x11xf32> to vector<5x1xf32>
    %50 = vector.broadcast %49 : vector<5x1xf32> to vector<5x4xf32>
    %51 = arith.addf %48, %50 : vector<5x4xf32>
    %cst_19 = arith.constant 0.000000e+00 : f32
    %52 = vector.broadcast %cst_19 : f32 to vector<5x4xf32>
    %53 = arith.maximumf %51, %52 : vector<5x4xf32>
    %c400 = arith.constant 400 : index
    %c0_20 = arith.constant 0 : index
    %54 = vector.load %arg2[%c400, %c0_20] : memref<696x384xf32, #tpu.memory_space<vmem>>, vector<64x6xf32>
    %55 = vector.extract_strided_slice %54 {offsets = [0, 0], sizes = [64, 5], strides = [1, 1]} : vector<64x6xf32> to vector<64x5xf32>
    %cst_21 = arith.constant dense<0.000000e+00> : vector<64x4xf32>
    %56 = tpu.matmul %55, %53, %cst_21 {dimension_numbers = #tpu.dot_dimension_numbers<[1], [0], [0], [1], [0, 0, 1, 1], [], []>} : vector<64x5xf32>, vector<5x4xf32>, vector<64x4xf32> -> vector<64x4xf32>
    %57 = vector.extract_strided_slice %54 {offsets = [0, 5], sizes = [64, 1], strides = [1, 1]} : vector<64x6xf32> to vector<64x1xf32>
    %58 = vector.broadcast %57 : vector<64x1xf32> to vector<64x4xf32>
    %59 = arith.addf %56, %58 : vector<64x4xf32>
    %60 = math.tanh %59 : vector<64x4xf32>
    %61 = vector.extract_strided_slice %60 {offsets = [0, 0], sizes = [8, 4], strides = [1, 1]} : vector<64x4xf32> to vector<8x4xf32>
    %62 = vector.extract_strided_slice %60 {offsets = [8, 0], sizes = [8, 4], strides = [1, 1]} : vector<64x4xf32> to vector<8x4xf32>
    %63 = vector.extract_strided_slice %60 {offsets = [16, 0], sizes = [8, 4], strides = [1, 1]} : vector<64x4xf32> to vector<8x4xf32>
    %64 = vector.extract_strided_slice %60 {offsets = [24, 0], sizes = [8, 4], strides = [1, 1]} : vector<64x4xf32> to vector<8x4xf32>
    %65 = vector.extract_strided_slice %60 {offsets = [32, 0], sizes = [8, 4], strides = [1, 1]} : vector<64x4xf32> to vector<8x4xf32>
    %66 = vector.extract_strided_slice %60 {offsets = [40, 0], sizes = [8, 4], strides = [1, 1]} : vector<64x4xf32> to vector<8x4xf32>
    %67 = vector.extract_strided_slice %60 {offsets = [48, 0], sizes = [8, 4], strides = [1, 1]} : vector<64x4xf32> to vector<8x4xf32>
    %68 = vector.extract_strided_slice %60 {offsets = [56, 0], sizes = [8, 4], strides = [1, 1]} : vector<64x4xf32> to vector<8x4xf32>
    %69 = tpu.concatenate %61, %62, %63, %64, %65, %66, %67, %68 in 1 : vector<8x4xf32>, vector<8x4xf32>, vector<8x4xf32>, vector<8x4xf32>, vector<8x4xf32>, vector<8x4xf32>, vector<8x4xf32>, vector<8x4xf32> -> vector<8x32xf32>
    %c464 = arith.constant 464 : index
    %c0_22 = arith.constant 0 : index
    %70 = vector.load %arg2[%c464, %c0_22] : memref<696x384xf32, #tpu.memory_space<vmem>>, vector<20x41xf32>
    %71 = vector.extract_strided_slice %70 {offsets = [0, 0], sizes = [20, 32], strides = [1, 1]} : vector<20x41xf32> to vector<20x32xf32>
    %72 = vector.extract_strided_slice %70 {offsets = [0, 32], sizes = [20, 8], strides = [1, 1]} : vector<20x41xf32> to vector<20x8xf32>
    %73 = vector.extract_strided_slice %70 {offsets = [0, 40], sizes = [20, 1], strides = [1, 1]} : vector<20x41xf32> to vector<20x1xf32>
    %cst_23 = arith.constant dense<0.000000e+00> : vector<20x1xf32>
    %74 = tpu.matmul %71, %1, %cst_23 {dimension_numbers = #tpu.dot_dimension_numbers<[1], [0], [0], [1], [0, 0, 1, 1], [], []>} : vector<20x32xf32>, vector<32x1xf32>, vector<20x1xf32> -> vector<20x1xf32>
    %75 = arith.addf %74, %73 : vector<20x1xf32>
    %cst_24 = arith.constant dense<0.000000e+00> : vector<20x32xf32>
    %76 = tpu.matmul %72, %69, %cst_24 {dimension_numbers = #tpu.dot_dimension_numbers<[1], [0], [0], [1], [0, 0, 1, 1], [], []>} : vector<20x8xf32>, vector<8x32xf32>, vector<20x32xf32> -> vector<20x32xf32>
    %77 = vector.broadcast %75 : vector<20x1xf32> to vector<20x32xf32>
    %78 = arith.addf %76, %77 : vector<20x32xf32>
    %cst_25 = arith.constant 0.000000e+00 : f32
    %79 = vector.broadcast %cst_25 : f32 to vector<20x32xf32>
    %80 = arith.maximumf %78, %79 : vector<20x32xf32>
    %c488 = arith.constant 488 : index
    %c0_26 = arith.constant 0 : index
    %81 = vector.load %arg2[%c488, %c0_26] : memref<696x384xf32, #tpu.memory_space<vmem>>, vector<10x21xf32>
    %82 = vector.extract_strided_slice %81 {offsets = [0, 0], sizes = [10, 20], strides = [1, 1]} : vector<10x21xf32> to vector<10x20xf32>
    %cst_27 = arith.constant dense<0.000000e+00> : vector<10x32xf32>
    %83 = tpu.matmul %82, %80, %cst_27 {dimension_numbers = #tpu.dot_dimension_numbers<[1], [0], [0], [1], [0, 0, 1, 1], [], []>} : vector<10x20xf32>, vector<20x32xf32>, vector<10x32xf32> -> vector<10x32xf32>
    %84 = vector.extract_strided_slice %81 {offsets = [0, 20], sizes = [10, 1], strides = [1, 1]} : vector<10x21xf32> to vector<10x1xf32>
    %85 = vector.broadcast %84 : vector<10x1xf32> to vector<10x32xf32>
    %86 = arith.addf %83, %85 : vector<10x32xf32>
    %cst_28 = arith.constant 0.000000e+00 : f32
    %87 = vector.broadcast %cst_28 : f32 to vector<10x32xf32>
    %88 = arith.maximumf %86, %87 : vector<10x32xf32>
    %c504 = arith.constant 504 : index
    %c0_29 = arith.constant 0 : index
    %89 = vector.load %arg2[%c504, %c0_29] : memref<696x384xf32, #tpu.memory_space<vmem>>, vector<5x11xf32>
    %90 = vector.extract_strided_slice %89 {offsets = [0, 0], sizes = [5, 10], strides = [1, 1]} : vector<5x11xf32> to vector<5x10xf32>
    %cst_30 = arith.constant dense<0.000000e+00> : vector<5x32xf32>
    %91 = tpu.matmul %90, %88, %cst_30 {dimension_numbers = #tpu.dot_dimension_numbers<[1], [0], [0], [1], [0, 0, 1, 1], [], []>} : vector<5x10xf32>, vector<10x32xf32>, vector<5x32xf32> -> vector<5x32xf32>
    %92 = vector.extract_strided_slice %89 {offsets = [0, 10], sizes = [5, 1], strides = [1, 1]} : vector<5x11xf32> to vector<5x1xf32>
    %93 = vector.broadcast %92 : vector<5x1xf32> to vector<5x32xf32>
    %94 = arith.addf %91, %93 : vector<5x32xf32>
    %cst_31 = arith.constant 0.000000e+00 : f32
    %95 = vector.broadcast %cst_31 : f32 to vector<5x32xf32>
    %96 = arith.maximumf %94, %95 : vector<5x32xf32>
    %c512 = arith.constant 512 : index
    %c0_32 = arith.constant 0 : index
    %97 = vector.load %arg2[%c512, %c0_32] : memref<696x384xf32, #tpu.memory_space<vmem>>, vector<64x6xf32>
    %98 = vector.extract_strided_slice %97 {offsets = [0, 0], sizes = [64, 5], strides = [1, 1]} : vector<64x6xf32> to vector<64x5xf32>
    %cst_33 = arith.constant dense<0.000000e+00> : vector<64x32xf32>
    %99 = tpu.matmul %98, %96, %cst_33 {dimension_numbers = #tpu.dot_dimension_numbers<[1], [0], [0], [1], [0, 0, 1, 1], [], []>} : vector<64x5xf32>, vector<5x32xf32>, vector<64x32xf32> -> vector<64x32xf32>
    %100 = vector.extract_strided_slice %97 {offsets = [0, 5], sizes = [64, 1], strides = [1, 1]} : vector<64x6xf32> to vector<64x1xf32>
    %101 = vector.broadcast %100 : vector<64x1xf32> to vector<64x32xf32>
    %102 = arith.addf %99, %101 : vector<64x32xf32>
    %103 = math.tanh %102 : vector<64x32xf32>
    %104 = vector.extract_strided_slice %103 {offsets = [0, 0], sizes = [8, 32], strides = [1, 1]} : vector<64x32xf32> to vector<8x32xf32>
    %105 = vector.extract_strided_slice %103 {offsets = [8, 0], sizes = [8, 32], strides = [1, 1]} : vector<64x32xf32> to vector<8x32xf32>
    %106 = vector.extract_strided_slice %103 {offsets = [16, 0], sizes = [8, 32], strides = [1, 1]} : vector<64x32xf32> to vector<8x32xf32>
    %107 = vector.extract_strided_slice %103 {offsets = [24, 0], sizes = [8, 32], strides = [1, 1]} : vector<64x32xf32> to vector<8x32xf32>
    %108 = vector.extract_strided_slice %103 {offsets = [32, 0], sizes = [8, 32], strides = [1, 1]} : vector<64x32xf32> to vector<8x32xf32>
    %109 = vector.extract_strided_slice %103 {offsets = [40, 0], sizes = [8, 32], strides = [1, 1]} : vector<64x32xf32> to vector<8x32xf32>
    %110 = vector.extract_strided_slice %103 {offsets = [48, 0], sizes = [8, 32], strides = [1, 1]} : vector<64x32xf32> to vector<8x32xf32>
    %111 = vector.extract_strided_slice %103 {offsets = [56, 0], sizes = [8, 32], strides = [1, 1]} : vector<64x32xf32> to vector<8x32xf32>
    %112 = tpu.concatenate %104, %105, %106, %107, %108, %109, %110, %111 in 1 : vector<8x32xf32>, vector<8x32xf32>, vector<8x32xf32>, vector<8x32xf32>, vector<8x32xf32>, vector<8x32xf32>, vector<8x32xf32>, vector<8x32xf32> -> vector<8x256xf32>
    %c576 = arith.constant 576 : index
    %c0_34 = arith.constant 0 : index
    %113 = vector.load %arg2[%c576, %c0_34] : memref<696x384xf32, #tpu.memory_space<vmem>>, vector<20x41xf32>
    %114 = vector.extract_strided_slice %113 {offsets = [0, 0], sizes = [20, 32], strides = [1, 1]} : vector<20x41xf32> to vector<20x32xf32>
    %115 = vector.extract_strided_slice %113 {offsets = [0, 32], sizes = [20, 8], strides = [1, 1]} : vector<20x41xf32> to vector<20x8xf32>
    %116 = vector.extract_strided_slice %113 {offsets = [0, 40], sizes = [20, 1], strides = [1, 1]} : vector<20x41xf32> to vector<20x1xf32>
    %cst_35 = arith.constant dense<0.000000e+00> : vector<20x1xf32>
    %117 = tpu.matmul %114, %1, %cst_35 {dimension_numbers = #tpu.dot_dimension_numbers<[1], [0], [0], [1], [0, 0, 1, 1], [], []>} : vector<20x32xf32>, vector<32x1xf32>, vector<20x1xf32> -> vector<20x1xf32>
    %118 = arith.addf %117, %116 : vector<20x1xf32>
    %cst_36 = arith.constant dense<0.000000e+00> : vector<20x256xf32>
    %119 = tpu.matmul %115, %112, %cst_36 {dimension_numbers = #tpu.dot_dimension_numbers<[1], [0], [0], [1], [0, 0, 1, 1], [], []>} : vector<20x8xf32>, vector<8x256xf32>, vector<20x256xf32> -> vector<20x256xf32>
    %120 = vector.broadcast %118 : vector<20x1xf32> to vector<20x256xf32>
    %121 = arith.addf %119, %120 : vector<20x256xf32>
    %cst_37 = arith.constant 0.000000e+00 : f32
    %122 = vector.broadcast %cst_37 : f32 to vector<20x256xf32>
    %123 = arith.maximumf %121, %122 : vector<20x256xf32>
    %c600 = arith.constant 600 : index
    %c0_38 = arith.constant 0 : index
    %124 = vector.load %arg2[%c600, %c0_38] : memref<696x384xf32, #tpu.memory_space<vmem>>, vector<10x21xf32>
    %125 = vector.extract_strided_slice %124 {offsets = [0, 0], sizes = [10, 20], strides = [1, 1]} : vector<10x21xf32> to vector<10x20xf32>
    %cst_39 = arith.constant dense<0.000000e+00> : vector<10x256xf32>
    %126 = tpu.matmul %125, %123, %cst_39 {dimension_numbers = #tpu.dot_dimension_numbers<[1], [0], [0], [1], [0, 0, 1, 1], [], []>} : vector<10x20xf32>, vector<20x256xf32>, vector<10x256xf32> -> vector<10x256xf32>
    %127 = vector.extract_strided_slice %124 {offsets = [0, 20], sizes = [10, 1], strides = [1, 1]} : vector<10x21xf32> to vector<10x1xf32>
    %128 = vector.broadcast %127 : vector<10x1xf32> to vector<10x256xf32>
    %129 = arith.addf %126, %128 : vector<10x256xf32>
    %cst_40 = arith.constant 0.000000e+00 : f32
    %130 = vector.broadcast %cst_40 : f32 to vector<10x256xf32>
    %131 = arith.maximumf %129, %130 : vector<10x256xf32>
    %c616 = arith.constant 616 : index
    %c0_41 = arith.constant 0 : index
    %132 = vector.load %arg2[%c616, %c0_41] : memref<696x384xf32, #tpu.memory_space<vmem>>, vector<5x11xf32>
    %133 = vector.extract_strided_slice %132 {offsets = [0, 0], sizes = [5, 10], strides = [1, 1]} : vector<5x11xf32> to vector<5x10xf32>
    %cst_42 = arith.constant dense<0.000000e+00> : vector<5x256xf32>
    %134 = tpu.matmul %133, %131, %cst_42 {dimension_numbers = #tpu.dot_dimension_numbers<[1], [0], [0], [1], [0, 0, 1, 1], [], []>} : vector<5x10xf32>, vector<10x256xf32>, vector<5x256xf32> -> vector<5x256xf32>
    %135 = vector.extract_strided_slice %132 {offsets = [0, 10], sizes = [5, 1], strides = [1, 1]} : vector<5x11xf32> to vector<5x1xf32>
    %136 = vector.broadcast %135 : vector<5x1xf32> to vector<5x256xf32>
    %137 = arith.addf %134, %136 : vector<5x256xf32>
    %cst_43 = arith.constant 0.000000e+00 : f32
    %138 = vector.broadcast %cst_43 : f32 to vector<5x256xf32>
    %139 = arith.maximumf %137, %138 : vector<5x256xf32>
    %c624 = arith.constant 624 : index
    %c0_44 = arith.constant 0 : index
    %140 = vector.load %arg2[%c624, %c0_44] : memref<696x384xf32, #tpu.memory_space<vmem>>, vector<64x6xf32>
    %141 = vector.extract_strided_slice %140 {offsets = [0, 0], sizes = [64, 5], strides = [1, 1]} : vector<64x6xf32> to vector<64x5xf32>
    %cst_45 = arith.constant dense<0.000000e+00> : vector<64x256xf32>
    %142 = tpu.matmul %141, %139, %cst_45 {dimension_numbers = #tpu.dot_dimension_numbers<[1], [0], [0], [1], [0, 0, 1, 1], [], []>} : vector<64x5xf32>, vector<5x256xf32>, vector<64x256xf32> -> vector<64x256xf32>
    %143 = vector.extract_strided_slice %140 {offsets = [0, 5], sizes = [64, 1], strides = [1, 1]} : vector<64x6xf32> to vector<64x1xf32>
    %144 = vector.broadcast %143 : vector<64x1xf32> to vector<64x256xf32>
    %145 = arith.addf %142, %144 : vector<64x256xf32>
    %146 = math.tanh %145 : vector<64x256xf32>
    %147 = vector.extract_strided_slice %146 {offsets = [0, 0], sizes = [8, 256], strides = [1, 1]} : vector<64x256xf32> to vector<8x256xf32>
    %148 = vector.extract_strided_slice %146 {offsets = [8, 0], sizes = [8, 256], strides = [1, 1]} : vector<64x256xf32> to vector<8x256xf32>
    %149 = vector.extract_strided_slice %146 {offsets = [16, 0], sizes = [8, 256], strides = [1, 1]} : vector<64x256xf32> to vector<8x256xf32>
    %150 = vector.extract_strided_slice %146 {offsets = [24, 0], sizes = [8, 256], strides = [1, 1]} : vector<64x256xf32> to vector<8x256xf32>
    %151 = vector.extract_strided_slice %146 {offsets = [32, 0], sizes = [8, 256], strides = [1, 1]} : vector<64x256xf32> to vector<8x256xf32>
    %152 = vector.extract_strided_slice %146 {offsets = [40, 0], sizes = [8, 256], strides = [1, 1]} : vector<64x256xf32> to vector<8x256xf32>
    %153 = vector.extract_strided_slice %146 {offsets = [48, 0], sizes = [8, 256], strides = [1, 1]} : vector<64x256xf32> to vector<8x256xf32>
    %154 = vector.extract_strided_slice %146 {offsets = [56, 0], sizes = [8, 256], strides = [1, 1]} : vector<64x256xf32> to vector<8x256xf32>
    %155 = tpu.concatenate %147, %148, %149, %150, %151, %152, %153, %154 in 1 : vector<8x256xf32>, vector<8x256xf32>, vector<8x256xf32>, vector<8x256xf32>, vector<8x256xf32>, vector<8x256xf32>, vector<8x256xf32>, vector<8x256xf32> -> vector<8x2048xf32>
    %c688 = arith.constant 688 : index
    %c0_46 = arith.constant 0 : index
    %156 = vector.load %arg2[%c688, %c0_46] : memref<696x384xf32, #tpu.memory_space<vmem>>, vector<3x9xf32>
    %157 = vector.extract_strided_slice %156 {offsets = [0, 0], sizes = [3, 8], strides = [1, 1]} : vector<3x9xf32> to vector<3x8xf32>
    %cst_47 = arith.constant dense<0.000000e+00> : vector<3x2048xf32>
    %158 = tpu.matmul %157, %155, %cst_47 {dimension_numbers = #tpu.dot_dimension_numbers<[1], [0], [0], [1], [0, 0, 1, 1], [], []>} : vector<3x8xf32>, vector<8x2048xf32>, vector<3x2048xf32> -> vector<3x2048xf32>
    %159 = vector.extract_strided_slice %156 {offsets = [0, 8], sizes = [3, 1], strides = [1, 1]} : vector<3x9xf32> to vector<3x1xf32>
    %160 = vector.broadcast %159 : vector<3x1xf32> to vector<3x2048xf32>
    %161 = arith.addf %158, %160 : vector<3x2048xf32>
    %162 = math.tanh %161 : vector<3x2048xf32>
    %c0_48 = arith.constant 0 : index
    %c0_49 = arith.constant 0 : index
    %c0_50 = arith.constant 0 : index
    %163 = vector.load %arg3[%c0_48, %c0_49, %c0_50] : memref<1x3x2048xf32, #tpu.memory_space<vmem>>, vector<1x3x2048xf32>
    %164 = vector.shape_cast %163 : vector<1x3x2048xf32> to vector<3x2048xf32>
    %165 = vector.shape_cast %162 : vector<3x2048xf32> to vector<1x3x2048xf32>
    tpu.vector_store %arg3[%c0_48, %c0_49, %c0_50], %165 {strides = array<i32>} : memref<1x3x2048xf32, #tpu.memory_space<vmem>>, vector<1x3x2048xf32>,
    return
  }
  func.func @transform_0(%arg0: i32) -> (i32, i32, i32) {
    %c0_i32 = arith.constant 0 : i32
    %c0_i32_0 = arith.constant 0 : i32
    %c0_i32_1 = arith.constant 0 : i32
    return %arg0, %c0_i32, %c0_i32_0 : i32, i32, i32
  }
  func.func @transform_1(%arg0: i32) -> (i32, i32) {
    %c0_i32 = arith.constant 0 : i32
    %c0_i32_0 = arith.constant 0 : i32
    %c0_i32_1 = arith.constant 0 : i32
    return %c0_i32, %c0_i32_0 : i32, i32
  }
  func.func @transform_2(%arg0: i32) -> (i32, i32, i32) {
    %c0_i32 = arith.constant 0 : i32
    %c0_i32_0 = arith.constant 0 : i32
    %c0_i32_1 = arith.constant 0 : i32
    return %arg0, %c0_i32, %c0_i32_0 : i32, i32, i32
  }
}

</mosaic_0001>

<bundles_post_ra>
// kernel: _lambda_.1
= control target key start
LH: loop header
LB: loop body
LE: loop exit
PB: predicated region body
PF: predicated region fallthrough
CT: control target
= control target key end

     0   :  { %7 = vsyncpa [#allocation3], 0  ;;  %s4291_s9 = smov 0   ;;  %s4758_s0 = inlined_call_operand.vmem [shape: f32[2,32,1], index: 0, kind: input, shape index: {}]   ;;  %s4759_s1 = inlined_call_operand.hbm [shape: f32[696,384], index: 1, kind: input, shape index: {}]   ;;  %s4760_s2 = inlined_call_operand.vmem [shape: f32[2,3,2048], index: 2, kind: output, shape index: {}]  }
   0x1 LB: > { %s4297_s10 = sadd.s32 4294967295, %s4248_s9   ;;  %p3441_p0 = scmp.ge.s32.totalorder %s4248_s9, 1  ;;  %s4248_s9 = sphi %s4291_s9, %s13_s9  }
   0x2   : > { %p91_p1 = scmp.lt.s32.totalorder %s4248_s9, 3  ;;  %s4250_s11 = smov [#allocation2]  }
   0x3   : > { %s103_s12 = sshll.u32 %s4250_s11, 4  ;;  %p4761_p3 = scmp.eq.s32.totalorder %s4297_s10, 0  ;;  %s104_s12 = int_to_ptr.vmem [resolvable:$true] %s103_s12 }
   0x4   : > { %p4301_p2 = pnand %p3441_p0, %p91_p1  ;;  %s4210_s17 = scalar_lea.hbm %s4759_s1, 33408 }
   0x5   : > { %p4211_p6 = scmp.ne.s32.totalorder %s4759_s1, %s4210_s17  ;;  %p4217_p10 = scmp.lt.u32.totalorder %s4210_s17, %s4759_s1 }
   0x6   : > { %s4763_s13 = scalar_select %p4301_p2, 1, 0 }
   0x7   : > { %p4043_p4 = pneg %p4301_p2 }
   0x9   : > { %p4310_p5 = pnand %p4761_p3, %p4043_p4 }
   0xb   : > { %p4212_p7 = pneg %p4310_p5 }
   0xd   : > { %p4213_p8 = pnand %p4212_p7, %p4211_p6 }
   0xf   : > { %p4214_p9 = pneg %p4213_p8 }
  0x11   : > { %p4219_p11 = pnand %p4217_p10, %p4214_p9 }
  0x13   : > { %4222 = shalt.err (!%p4219_p11)
}
  0x14   : > { %s4223_s22 = scalar_lea.vmem %s104_s12, 33408  ;;  %p4231_p1 = scmp.lt.s32.totalorder %s104_s12, %s104_s12 }
  0x15   : > { %p4224_p12 = scmp.ne.s32.totalorder %s104_s12, %s4223_s22  ;;  %p4232_p4 = scmp.lt.s32.totalorder %s4223_s22, %s4223_s22 }
  0x17   : > { %p4226_p13 = pnand %p4224_p12, %p4212_p7  ;;  %p4233_p3 = por %p4232_p4, %p4231_p1 }
  0x19   : > { %p4227_p0 = pneg %p4226_p13 }
  0x1b   : > { %p4234_p2 = pnand %p4233_p3, %p4227_p0 }
  0x1d   : > { %4237 = shalt.err (!%p4234_p2)
}
  0x1e   : > { %s4251_s23 = smov 384   ;;  %s4252_s24 = smov 24  }
  0x1f   : > { %4046 = dma.hbm_to_vmem [thread:$0]  (!%p4310_p5), %s4759_s1, 33408, %s104_s12, [#allocation3], %s4251_s23, %s4251_s23, %s4252_s24  }
  0x20   : > { %p4765_p6 = scmp.ne.s32.totalorder %s4763_s13, 0 }
  0x21   : > { %p4766_p8 = scmp.eq.s32.totalorder (!%p4765_p6), %s4297_s10, 0 }
  0x22   : > { %127 = sbr.rel (%p4765_p6) target bundleno = 4156 (0x103c), region = 28 }
  0x29   : > { %4243 = dma.done.wait (%p4766_p8), [#allocation3], 33408   ;;  %p4767_p7 = pmov %p4766_p8 }
  0x2a   : > { %p149_p2 = scmp.lt.s32.totalorder %s4297_s10, 1  ;;  %vm323_vm0 = vcmask 261120   ;;  %v163_v5 = vld [vmem:[#allocation2] sm:$0xff]  ;;  %s4253_s3 = smov 96   ;;  %v164_v7 = vld [vmem:[#allocation2 + $0x18] sm:$0xff]  ;;  %v165_v9 = vld [vmem:[#allocation2 + $0x30] sm:$0xff] }
  0x2b   : > { %4245 = vsyncadd (%p4767_p7), [#allocation3], 4294933888  ;;  %3736 = vmatprep.mubr.msk.f32.mxu0 %vm323_vm0, %v163_v5  ;;  %227 = vrot.lane.b32.xlu1 %v163_v5, %s4253_s3  ;;  %v179_v8 = vld [vmem:[#allocation2 + $0x180] sm:$0xff]  ;;  %v182_v10 = vld [vmem:[#allocation2 + $0x1c8] sm:$0xff]  ;;  %vm802_vm1 = vcmask 523264   ;;  %s4254_s4 = smov 64  }
  0x2c   : > { %s4771_s10 = smov (!%p149_p2, %s4297_s10), 1  ;;  %259 = vrot.lane.b32.xlu0 %v179_v8, %s4253_s3  ;;  %v180_v11 = vld [vmem:[#allocation2 + $0x198] sm:$0xff]  ;;  %v166_v12 = vld [vmem:[#allocation2 + $0x48] sm:$0xff]  ;;  %v167_v13 = vld [vmem:[#allocation2 + $0x60] sm:$0xff]  ;;  %vm4256_vm2 = vmmov 0   ;;  %s4258_s5 = smov 1  }
  0x2d   : > { %s3559_s27 = sshll.u32 %s4771_s10, 5  ;;  %v181_v14 = vld [vmem:[#allocation2 + $0x1b0] sm:$0xff]  ;;  %v168_v15 = vld [vmem:[#allocation2 + $0x78] sm:$0xff]  ;;  %v170_v18 = vld [vmem:[#allocation2 + $0xa8] sm:$0xff]  ;;  %s4259_s6 = smov 3   ;;  %vm912_vm3 = vcmask 7168  }
  0x2e   : > { %s153_s30 = scalar_lea.vmem %s4758_s0, %s3559_s27  ;;  %v169_v16 = vld [vmem:[#allocation2 + $0x90] sm:$0xff]  ;;  %v184_v17 = vld [vmem:[#allocation2 + $0x1f8] sm:$0xff]  ;;  %v171_v19 = vld [vmem:[#allocation2 + $0xc0] sm:$0xff]  ;;  %s4260_s7 = smov 2   ;;  %vm914_vm4 = vcmask 15360   ;;  %vm916_vm5 = vcmask 23552  }
  0x2f   : > { %v159_v0 = vld [vmem:[%s153_s30] sm:$0xff]  ;;  %v160_v1 = vld [vmem:[%s153_s30 + $0x8] sm:$0xff]  ;;  %v161_v2 = vld [vmem:[%s153_s30 + $0x10] sm:$0xff]  ;;  %229 = vrot.lane.b32.xlu1 %v164_v7, %s4253_s3  ;;  %s4262_s8 = smov 88   ;;  %vm1040_vm6 = vcmask 64512   ;;  %vm1142_vm7 = vcmask 162816  }
  0x30   : > { %v4344_v3 = vpack.c.bf16 %v160_v1, %v159_v0  ;;  %v162_v4 = vld [vmem:[%s153_s30 + $0x18] sm:$0xff]  ;;  %261 = vrot.lane.b32.xlu0 %v180_v11, %s4253_s3  ;;  %v183_v20 = vld [vmem:[#allocation2 + $0x1e0] sm:$0xff]  ;;  %v173_v22 = vld [vmem:[#allocation2 + $0xf0] sm:$0xff]  ;;  %vm1147_vm8 = vcmask 1043456   ;;  %vm1237_vm9 = vcmask 1041408   ;;  %vm4265_vm10 = vmmov 1  }
  0x31   : > { %v4346_v6 = vpack.c.bf16 %v162_v4, %v161_v2  ;;  %v172_v21 = vld [vmem:[#allocation2 + $0xd8] sm:$0xff]  ;;  %v186_v23 = vld [vmem:[#allocation2 + $0x228] sm:$0xff]  ;;  %v175_v25 = vld [vmem:[#allocation2 + $0x120] sm:$0xff]  ;;  %vm1234_vm12 = vcmask 80896   ;;  %vm1360_vm13 = vcmask 39936   ;;  %vm1377_vm14 = vcmask 1044480  }
  0x32   : > { %3940 = vmatprep.subr.bf16.mxu0 %v4344_v3  ;;  %v174_v24 = vld [vmem:[#allocation2 + $0x108] sm:$0xff]  ;;  %v185_v26 = vld [vmem:[#allocation2 + $0x210] sm:$0xff]  ;;  %v176_v27 = vld [vmem:[#allocation2 + $0x138] sm:$0xff]  ;;  %s4267_s11 = smov 4   ;;  %s4268_s12 = smov 12   ;;  %vm1522_vm15 = vcmask 31744  }
  0x33   : > { %3942 = vmatpush3.bf16.msra.mxu0 %v4344_v3  ;;  %265 = vrot.lane.b32.xlu1 %v182_v10, %s4253_s3  ;;  %v177_v28 = vld [vmem:[#allocation2 + $0x150] sm:$0xff]  ;;  %v188_v29 = vld [vmem:[#allocation2 + $0x258] sm:$0xff]  ;;  %v178_v30 = vld [vmem:[#allocation2 + $0x168] sm:$0xff]  ;;  %s4269_s13 = smov 8   ;;  %s4270_s14 = smov 20  }
  0x34   : > { %3944 = vmatprep.subr.bf16.mxu0 %v4346_v6  ;;  %263 = vrot.lane.b32.xlu0 %v181_v14, %s4253_s3  ;;  %v187_v31 = vld [vmem:[#allocation2 + $0x240] sm:$0xff]  ;;  %v190_v32 = vld [vmem:[#allocation2 + $0x288] sm:$0xff]  ;;  %v189_v33 = vld [vmem:[#allocation2 + $0x270] sm:$0xff]  ;;  %s4271_s15 = smov 16   ;;  %s4272_s16 = smov 28  }
  0x35   : > { %v192_v34 = vld [vmem:[#allocation2 + $0x2b8] sm:$0xff]  ;;  %v191_v35 = vld [vmem:[#allocation2 + $0x2a0] sm:$0xff]  ;;  %v194_v36 = vld [vmem:[#allocation2 + $0x2e8] sm:$0xff]  ;;  %s4273_s17 = smov 24   ;;  %s4274_s18 = smov 32  }
  0x36   : > { %v193_v37 = vld [vmem:[#allocation2 + $0x2d0] sm:$0xff]  ;;  %v646_v40 = vld [vmem:[#allocation2 + $0x308] sm:$0xff]  ;;  %vm4549_vm11 = vmpackc.low %vm1237_vm9, %vm4265_vm10  ;;  %vm1532_vm9 = vcmask 228352   ;;  %s3560_s19 = sshll.u32 %s4771_s10, 6 }
  0x37   : > { %3946 = vmatpush3.bf16.msra.mxu0 %v4346_v6  ;;  %233 = vrot.lane.b32.xlu1 %v166_v12, %s4253_s3  ;;  %s4736_s22 = scalar_lea.vmem %s4760_s2, %s3560_s19 }
  0x38   : > { %231 = vrot.lane.b32.xlu0 %v165_v9, %s4253_s3  ;;  %733 = vmatprep.mubr.f32.mxu1 %v646_v40 }
  0x3a   : > { %3737 = vmatmul.mubr.msk.f32.vlgmr.msra.gmra.mrb[0].mxu0 %vm323_vm0, %v164_v7 }
  0x3b   : > { %3739 = vmatprep.mubr.msk.f32.mxu0 %vm323_vm0, %v165_v9  ;;  %269 = vrot.lane.b32.xlu1 %v184_v17, %s4253_s3 }
  0x3c   : > { %267 = vrot.lane.b32.xlu0 %v183_v20, %s4253_s3 }
  0x3e   : > { %3740 = vmatmul.mubr.msk.f32.gmra.mrb[2].mxu0 %vm323_vm0, %v166_v12 }
  0x3f   : > { %3742 = vmatprep.mubr.msk.f32.mxu0 %vm323_vm0, %v167_v13  ;;  %237 = vrot.lane.b32.xlu1 %v168_v15, %s4253_s3 }
  0x40   : > { %235 = vrot.lane.b32.xlu0 %v167_v13, %s4253_s3 }
  0x42   : > { %3743 = vmatmul.mubr.msk.f32.gmra.mrb[4].mxu0 %vm323_vm0, %v168_v15 }
  0x43   : > { %3745 = vmatprep.mubr.msk.f32.mxu0 %vm323_vm0, %v169_v16  ;;  %273 = vrot.lane.b32.xlu1 %v186_v23, %s4253_s3 }
  0x44   : > { %271 = vrot.lane.b32.xlu0 %v185_v26, %s4253_s3 }
  0x46   : > { %3746 = vmatmul.mubr.msk.f32.gmra.mrb[6].mxu0 %vm323_vm0, %v170_v18 }
  0x47   : > { %3748 = vmatprep.mubr.msk.f32.mxu0 %vm323_vm0, %v171_v19  ;;  %241 = vrot.lane.b32.xlu1 %v170_v18, %s4253_s3 }
  0x48   : > { %239 = vrot.lane.b32.xlu0 %v169_v16, %s4253_s3 }
  0x4a   : > { %3749 = vmatmul.mubr.msk.f32.gmra.mrb[8].mxu0 %vm323_vm0, %v172_v21 }
  0x4b   : > { %3751 = vmatprep.mubr.msk.f32.mxu0 %vm323_vm0, %v173_v22  ;;  %277 = vrot.lane.b32.xlu1 %v188_v29, %s4253_s3 }
  0x4c   : > { %275 = vrot.lane.b32.xlu0 %v187_v31, %s4253_s3 }
  0x4e   : > { %3752 = vmatmul.mubr.msk.f32.gmra.mrb[10].mxu0 %vm323_vm0, %v174_v24 }
  0x4f   : > { %3754 = vmatprep.mubr.msk.f32.mxu0 %vm323_vm0, %v175_v25  ;;  %245 = vrot.lane.b32.xlu1 %v172_v21, %s4253_s3 }
  0x50   : > { %243 = vrot.lane.b32.xlu0 %v171_v19, %s4253_s3 }
  0x52   : > { %3755 = vmatmul.mubr.msk.f32.gmra.mrb[12].mxu0 %vm323_vm0, %v176_v27 }
  0x53   : > { %3757 = vmatprep.mubr.msk.f32.mxu0 %vm323_vm0, %v177_v28  ;;  %281 = vrot.lane.b32.xlu1 %v190_v32, %s4253_s3 }
  0x54   : > { %279 = vrot.lane.b32.xlu0 %v189_v33, %s4253_s3 }
  0x56   : > { %3758 = vmatmul.mubr.msk.f32.gmra.mrb[14].mxu0 %vm323_vm0, %v178_v30 }
  0x57   : > { %3760 = vmatprep.mubr.msk.f32.mxu0 %vm323_vm0, %v179_v8  ;;  %249 = vrot.lane.b32.xlu1 %v174_v24, %s4253_s3 }
  0x58   : > { %247 = vrot.lane.b32.xlu0 %v173_v22, %s4253_s3 }
  0x5a   : > { %3761 = vmatmul.mubr.msk.f32.gmra.mrb[16].mxu0 %vm323_vm0, %v180_v11 }
  0x5b   : > { %3763 = vmatprep.mubr.msk.f32.mxu0 %vm323_vm0, %v181_v14  ;;  %285 = vrot.lane.b32.xlu1 %v192_v34, %s4253_s3 }
  0x5c   : > { %283 = vrot.lane.b32.xlu0 %v191_v35, %s4253_s3 }
  0x5e   : > { %3764 = vmatmul.mubr.msk.f32.gmra.mrb[18].mxu0 %vm323_vm0, %v182_v10 }
  0x5f   : > { %3766 = vmatprep.mubr.msk.f32.mxu0 %vm323_vm0, %v183_v20  ;;  %253 = vrot.lane.b32.xlu1 %v176_v27, %s4253_s3 }
  0x60   : > { %251 = vrot.lane.b32.xlu0 %v175_v25, %s4253_s3 }
  0x62   : > { %3767 = vmatmul.mubr.msk.f32.gmra.mrb[20].mxu0 %vm323_vm0, %v184_v17 }
  0x63   : > { %3769 = vmatprep.mubr.msk.f32.mxu0 %vm323_vm0, %v185_v26  ;;  %289 = vrot.lane.b32.xlu1 %v194_v36, %s4253_s3 }
  0x64   : > { %287 = vrot.lane.b32.xlu0 %v193_v37, %s4253_s3 }
  0x66   : > { %3770 = vmatmul.mubr.msk.f32.gmra.mrb[22].mxu0 %vm323_vm0, %v186_v23 }
  0x67   : > { %3772 = vmatprep.mubr.msk.f32.mxu0 %vm323_vm0, %v187_v31  ;;  %257 = vrot.lane.b32.xlu1 %v178_v30, %s4253_s3 }
  0x68   : > { %255 = vrot.lane.b32.xlu0 %v177_v28, %s4253_s3 }
  0x6a   : > { %3773 = vmatmul.mubr.msk.f32.gmra.mrb[24].mxu0 %vm323_vm0, %v188_v29 }
  0x6b   : > { %3775 = vmatprep.mubr.msk.f32.mxu0 %vm323_vm0, %v189_v33 }
  0x6e   : > { %3776 = vmatmul.mubr.msk.f32.gmra.mrb[26].mxu0 %vm323_vm0, %v190_v32 }
  0x6f   : > { %3778 = vmatprep.mubr.msk.f32.mxu0 %vm323_vm0, %v191_v35 }
  0x72   : > { %3779 = vmatmul.mubr.msk.f32.gmra.mrb[28].mxu0 %vm323_vm0, %v192_v34 }
  0x73   : > { %3781 = vmatprep.mubr.msk.f32.mxu0 %vm323_vm0, %v193_v37 }
  0x76   : > { %3782 = vmatmul.mubr.msk.f32.gmra.mrb[30].mxu0 %vm323_vm0, %v194_v36 }
  0x9d   : > { %v228_v38 = vpop.permute.xlu1 %227 }
  0x9e   : > { %v4416_v39 = vpop.permute.xlu0 %259 }
  0xa1   : > { %v230_v41 = vpop.permute.xlu1 %229 }
  0xa2   : > { %v4418_v42 = vpop.permute.xlu0 %261 }
  0xa5   : > { %v4420_v43 = vpop.permute.xlu1 %265 }
  0xa6   : > { %v4422_v44 = vpop.permute.xlu0 %263 }
  0xa9   : > { %v234_v45 = vpop.permute.xlu1 %233 }
  0xaa   : > { %v232_v46 = vpop.permute.xlu0 %231 }
  0xad   : > { %v4424_v47 = vpop.permute.xlu1 %269 }
  0xae   : > { %v4426_v48 = vpop.permute.xlu0 %267 }
  0xb1   : > { %v238_v49 = vpop.permute.xlu1 %237 }
  0xb2   : > { %v236_v50 = vpop.permute.xlu0 %235 }
  0xb5   : > { %v4428_v51 = vpop.permute.xlu1 %273 }
  0xb6   : > { %v4430_v52 = vpop.permute.xlu0 %271 }
  0xb9   : > { %v242_v53 = vpop.permute.xlu1 %241 }
  0xba   : > { %v240_v54 = vpop.permute.xlu0 %239 }
  0xbd   : > { %v4432_v55 = vpop.permute.xlu1 %277 }
  0xbe   : > { %v4434_v56 = vpop.permute.xlu0 %275 }
  0xc1   : > { %v246_v57 = vpop.permute.xlu1 %245 }
  0xc2   : > { %v244_v58 = vpop.permute.xlu0 %243 }
  0xc5   : > { %v4436_v59 = vpop.permute.xlu1 %281 }
  0xc6   : > { %v4438_v60 = vpop.permute.xlu0 %279 }
  0xc9   : > { %v250_v1 = vpop.permute.xlu1 %249 }
  0xca   : > { %v248_v4 = vpop.permute.xlu0 %247 }
  0xcd   : > { %v4442_v15 = vpop.permute.xlu1 %285 }
  0xce   : > { %v4444_v18 = vpop.permute.xlu0 %283 }
  0xd1   : > { %v254_v28 = vpop.permute.xlu1 %253 }
  0xd2   : > { %v252_v30 = vpop.permute.xlu0 %251 }
 0x10d   : > { %v3738_v61 = vpop.f32.mrb[0].mxu0 }
 0x10e   : > { %v460_v62 = vadd.f32 %v3738_v61, %v230_v41  ;;  %v454_v63 = vpop.f32.mrb[1].mxu0  ;;  %v4452_v41 = vpop.permute.xlu1 %289 }
 0x10f   : > { %v455_v0 = vadd.f32 %v454_v63, %v228_v38 }
 0x110   : > { %v614_v2 = vmax.f32 %v460_v62, 0.0 }
 0x111   : > { %v613_v5 = vmax.f32 %v455_v0, 0.0  ;;  %v3741_v7 = vpop.f32.mrb[2].mxu0 }
 0x112   : > { %v470_v8 = vadd.f32 %v3741_v7, %v234_v45  ;;  %v464_v9 = vpop.f32.mrb[3].mxu0 }
 0x113   : > { %v465_v10 = vadd.f32 %v464_v9, %v232_v46  ;;  %v4440_v11 = vpack.c.bf16 %v614_v2, %v613_v5  ;;  %v258_v2 = vpop.permute.xlu1 %257 }
 0x114   : > { %v616_v12 = vmax.f32 %v470_v8, 0.0 }
 0x115   : > { %v615_v13 = vmax.f32 %v465_v10, 0.0  ;;  %v3744_v14 = vpop.f32.mrb[4].mxu0 }
 0x116   : > { %v480_v16 = vadd.f32 %v3744_v14, %v238_v49  ;;  %v474_v17 = vpop.f32.mrb[5].mxu0  ;;  %v4454_v49 = vpop.permute.xlu0 %287 }
 0x117   : > { %v4446_v19 = vpack.c.bf16 %v616_v12, %v615_v13  ;;  %v475_v20 = vadd.f32 %v474_v17, %v236_v50 }
 0x118   : > { %v618_v21 = vmax.f32 %v480_v16, 0.0 }
 0x119   : > { %v617_v22 = vmax.f32 %v475_v20, 0.0  ;;  %v3747_v23 = vpop.f32.mrb[6].mxu0 }
 0x11a   : > { %v490_v24 = vadd.f32 %v3747_v23, %v242_v53  ;;  %v484_v25 = vpop.f32.mrb[7].mxu0  ;;  %v256_v7 = vpop.permute.xlu0 %255 }
 0x11b   : > { %v4448_v26 = vpack.c.bf16 %v618_v21, %v617_v22  ;;  %v485_v27 = vadd.f32 %v484_v25, %v240_v54 }
 0x11c   : > { %v620_v29 = vmax.f32 %v490_v24, 0.0 }
 0x11d   : > { %v619_v31 = vmax.f32 %v485_v27, 0.0  ;;  %v3750_v32 = vpop.f32.mrb[8].mxu0 }
 0x11e   : > { %v500_v33 = vadd.f32 %v3750_v32, %v246_v57  ;;  %v494_v34 = vpop.f32.mrb[9].mxu0 }
 0x11f   : > { %v4450_v35 = vpack.c.bf16 %v620_v29, %v619_v31  ;;  %v495_v36 = vadd.f32 %v494_v34, %v244_v58 }
 0x120   : > { %v622_v37 = vmax.f32 %v500_v33, 0.0 }
 0x121   : > { %v621_v38 = vmax.f32 %v495_v36, 0.0  ;;  %v3753_v40 = vpop.f32.mrb[10].mxu0 }
 0x122   : > { %v510_v45 = vadd.f32 %v3753_v40, %v250_v1  ;;  %v504_v46 = vpop.f32.mrb[11].mxu0 }
 0x123   : > { %v4456_v50 = vpack.c.bf16 %v622_v37, %v621_v38  ;;  %v505_v53 = vadd.f32 %v504_v46, %v248_v4 }
 0x124   : > { %v624_v54 = vmax.f32 %v510_v45, 0.0 }
 0x125   : > { %v623_v61 = vmax.f32 %v505_v53, 0.0  ;;  %v3756_v62 = vpop.f32.mrb[12].mxu0 }
 0x126   : > { %v520_v57 = vadd.f32 %v3756_v62, %v254_v28  ;;  %v514_v63 = vpop.f32.mrb[13].mxu0 }
 0x127   : > { %v4458_v0 = vpack.c.bf16 %v624_v54, %v623_v61  ;;  %v515_v58 = vadd.f32 %v514_v63, %v252_v30 }
 0x128   : > { %v626_v5 = vmax.f32 %v520_v57, 0.0 }
 0x129   : > { %v625_v8 = vmax.f32 %v515_v58, 0.0  ;;  %v3759_v9 = vpop.f32.mrb[14].mxu0 }
 0x12a   : > { %v530_v1 = vadd.f32 %v3759_v9, %v258_v2  ;;  %v524_v10 = vpop.f32.mrb[15].mxu0 }
 0x12b   : > { %v4460_v12 = vpack.c.bf16 %v626_v5, %v625_v8  ;;  %v525_v13 = vadd.f32 %v524_v10, %v256_v7 }
 0x12c   : > { %v628_v14 = vmax.f32 %v530_v1, 0.0 }
 0x12d   : > { %v627_v4 = vmax.f32 %v525_v13, 0.0  ;;  %v3762_v16 = vpop.f32.mrb[16].mxu0 }
 0x12e   : > { %v540_v17 = vadd.f32 %v3762_v16, %v4418_v42  ;;  %v534_v20 = vpop.f32.mrb[17].mxu0  ;;  %v649_v16 = vld [vmem:[#allocation2 + $0x320] sm:$0xff] }
 0x12f   : > { %v4463_v21 = vpack.c.bf16 %v628_v14, %v627_v4  ;;  %v535_v22 = vadd.f32 %v534_v20, %v4416_v39  ;;  %v655_v20 = vld [vmem:[#allocation2 + $0x350] sm:$0xff] }
 0x130   : > { %v630_v23 = vmax.f32 %v540_v17, 0.0  ;;  %v652_v17 = vld [vmem:[#allocation2 + $0x338] sm:$0xff] }
 0x131   : > { %v629_v24 = vmax.f32 %v535_v22, 0.0  ;;  %v3765_v25 = vpop.f32.mrb[18].mxu0  ;;  %v658_v22 = vld [vmem:[#allocation2 + $0x368] sm:$0xff] }
 0x132   : > { %v550_v27 = vadd.f32 %v3765_v25, %v4420_v43  ;;  %v544_v28 = vpop.f32.mrb[19].mxu0  ;;  %v663_v25 = vld [vmem:[#allocation2 + $0x390] sm:$0xff] }
 0x133   : > { %v545_v29 = vadd.f32 %v544_v28, %v4422_v44  ;;  %v3947_v30 = vpack.c.bf16 %v630_v23, %v629_v24  ;;  %v661_v23 = vld [vmem:[#allocation2 + $0x380] sm:$0xff]  ;;  %v664_v24 = vld [vmem:[#allocation2 + $0x398] sm:$0xff]  ;;  %v666_v28 = vld [vmem:[#allocation2 + $0x3a8] sm:$0xff] }
 0x134   : > { %v632_v31 = vmax.f32 %v550_v27, 0.0  ;;  %v667_v27 = vld [vmem:[#allocation2 + $0x3b0] sm:$0xff] }
 0x135   : > { %v631_v32 = vmax.f32 %v545_v29, 0.0  ;;  %v3768_v33 = vpop.f32.mrb[20].mxu0  ;;  %3948 = vmatprep.subr.bf16.mxu1 %v3947_v30  ;;  %v782_v29 = vld [vmem:[#allocation2 + $0x3c0] sm:$0xff]  ;;  %v4489_v30 = vld [vmem:[#allocation2 + $0x3d8] sm:$0xff] }
 0x136   : > { %v560_v42 = vadd.f32 %v3768_v33, %v4424_v47  ;;  %v554_v34 = vpop.f32.mrb[21].mxu0  ;;  %3950 = vmatpush3.bf16.msra.mxu1 %v4440_v11  ;;  %792 = vrot.lane.b32.xlu0 %v4489_v30, %s4254_s4  ;;  %v4499_v33 = vld [vmem:[#allocation2 + $0x408] sm:$0xff] }
 0x137   : > { %v3951_v36 = vpack.c.bf16 %v632_v31, %v631_v32  ;;  %v555_v39 = vadd.f32 %v554_v34, %v4426_v48  ;;  %v4491_v31 = vld [vmem:[#allocation2 + $0x3f0] sm:$0xff]  ;;  %v4255_v32 = vmov 0.0|0.0  }
 0x138   : > { %v634_v37 = vmax.f32 %v560_v42, 0.0  ;;  %794 = vrot.lane.b32.xlu1 %v4491_v31, %s4254_s4  ;;  %3995 = vmatprep.subr.bf16.mxu0 %v4255_v32 }
 0x139   : > { %v633_v38 = vmax.f32 %v555_v39, 0.0  ;;  %v3771_v40 = vpop.f32.mrb[22].mxu0  ;;  %3952 = vmatprep.subr.bf16.mxu1 %v3951_v36  ;;  %3997 = vmatpush3.bf16.msra.mxu0 %v4344_v3  ;;  %v647_v39 = vld [vmem:[#allocation2 + $0x310] sm:$0xff] }
 0x13a   : > { %v570_v43 = vadd.f32 %v3771_v40, %v4428_v51  ;;  %v564_v44 = vpop.f32.mrb[23].mxu0  ;;  %3954 = vmatpush3.bf16.msra.mxu1 %v4446_v19  ;;  %3998 = vmatprep.subr.bf16.mxu0 %v4255_v32 }
 0x13b   : > { %v3955_v45 = vpack.c.bf16 %v634_v37, %v633_v38  ;;  %v565_v46 = vadd.f32 %v564_v44, %v4430_v52  ;;  %796 = vrot.lane.b32.xlu0 %v4499_v33, %s4254_s4  ;;  %v650_v38 = vld [vmem:[#allocation2 + $0x328] sm:$0xff] }
 0x13c   : > { %v636_v53 = vmax.f32 %v570_v43, 0.0  ;;  %790 = vrot.lane.b32.xlu1 %v782_v29, %s4254_s4 }
 0x13d   : > { %v635_v47 = vmax.f32 %v565_v46, 0.0  ;;  %v3774_v54 = vpop.f32.mrb[24].mxu0  ;;  %3956 = vmatprep.subr.bf16.mxu1 %v3955_v45  ;;  %4000 = vmatpush3.bf16.msra.mxu0 %v4346_v6 }
 0x13e   : > { %v580_v11 = vadd.f32 %v3774_v54, %v4432_v55  ;;  %v574_v61 = vpop.f32.mrb[25].mxu0  ;;  %3958 = vmatpush3.bf16.msra.mxu1 %v4448_v26 }
 0x13f   : > { %v3959_v48 = vpack.c.bf16 %v636_v53, %v635_v47  ;;  %v575_v62 = vadd.f32 %v574_v61, %v4434_v56  ;;  %v653_v61 = vld [vmem:[#allocation2 + $0x340] sm:$0xff] }
 0x140   : > { %v638_v57 = vmax.f32 %v580_v11, 0.0 }
 0x141   : > { %v637_v51 = vmax.f32 %v575_v62, 0.0  ;;  %v3777_v63 = vpop.f32.mrb[26].mxu0  ;;  %3960 = vmatprep.subr.bf16.mxu1 %v3959_v48 }
 0x142   : > { %v590_v19 = vadd.f32 %v3777_v63, %v4436_v59  ;;  %v584_v58 = vpop.f32.mrb[27].mxu0  ;;  %3962 = vmatpush3.bf16.msra.mxu1 %v4450_v35 }
 0x143   : > { %v3963_v52 = vpack.c.bf16 %v638_v57, %v637_v51  ;;  %v585_v2 = vadd.f32 %v584_v58, %v4438_v60  ;;  %v656_v57 = vld [vmem:[#allocation2 + $0x358] sm:$0xff] }
 0x144   : > { %v640_v5 = vmax.f32 %v590_v19, 0.0 }
 0x145   : > { %v639_v55 = vmax.f32 %v585_v2, 0.0  ;;  %v3780_v7 = vpop.f32.mrb[28].mxu0  ;;  %3964 = vmatprep.subr.bf16.mxu1 %v3963_v52 }
 0x146   : > { %v600_v26 = vadd.f32 %v3780_v7, %v4442_v15  ;;  %v594_v8 = vpop.f32.mrb[29].mxu0  ;;  %3966 = vmatpush3.bf16.msra.mxu1 %v4456_v50 }
 0x147   : > { %v3967_v56 = vpack.c.bf16 %v640_v5, %v639_v55  ;;  %v595_v9 = vadd.f32 %v594_v8, %v4444_v18  ;;  %v645_v18 = vld [vmem:[#allocation2 + $0x300] sm:$0xff] }
 0x148   : > { %v642_v1 = vmax.f32 %v600_v26, 0.0  ;;  %v659_v26 = vld [vmem:[#allocation2 + $0x370] sm:$0xff] }
 0x149   : > { %v641_v59 = vmax.f32 %v595_v9, 0.0  ;;  %v3783_v10 = vpop.f32.mrb[30].mxu0  ;;  %3968 = vmatprep.subr.bf16.mxu1 %v3967_v56  ;;  %v662_v9 = vld [vmem:[#allocation2 + $0x388] sm:$0xff] }
 0x14a   : > { %v610_v35 = vadd.f32 %v3783_v10, %v4452_v41  ;;  %v604_v13 = vpop.f32.mrb[31].mxu0  ;;  %3970 = vmatpush3.bf16.msra.mxu1 %v4458_v0  ;;  %v648_v41 = vld [vmem:[#allocation2 + $0x318] sm:$0xff]  ;;  %v651_v0 = vld [vmem:[#allocation2 + $0x330] sm:$0xff] }
 0x14b   : > { %v3971_v60 = vpack.c.bf16 %v642_v1, %v641_v59  ;;  %v605_v14 = vadd.f32 %v604_v13, %v4454_v49  ;;  %v654_v49 = vld [vmem:[#allocation2 + $0x348] sm:$0xff] }
 0x14c   : > { %v644_v4 = vmax.f32 %v610_v35, 0.0 }
 0x14d   : > { %v643_v15 = vmax.f32 %v605_v14, 0.0  ;;  %3972 = vmatprep.subr.bf16.mxu1 %v3971_v60 }
 0x14e   : > { %3974 = vmatpush3.bf16.msra.mxu1 %v4460_v12  ;;  %v657_v12 = vld [vmem:[#allocation2 + $0x360] sm:$0xff] }
 0x14f   : > { %v3975_v50 = vpack.c.bf16 %v644_v4, %v643_v15 }
 0x151   : > { %3976 = vmatprep.subr.bf16.mxu1 %v3975_v50  ;;  %v665_v50 = vld [vmem:[#allocation2 + $0x3a0] sm:$0xff] }
 0x152   : > { %3978 = vmatpush3.bf16.msra.mxu1 %v4463_v21  ;;  %v660_v21 = vld [vmem:[#allocation2 + $0x378] sm:$0xff] }
 0x155   : > { %734 = vmatmul.mubr.f32.vlgmr.msra.gmra.mrb[0].mxu1 %v645_v18 }
 0x156   : > { %738 = vmatprep.mubr.f32.mxu1 %v649_v16 }
 0x159   : > { %739 = vmatmul.mubr.f32.gmra.mrb[2].mxu1 %v648_v41  ;;  %v668_v41 = vld [vmem:[#allocation2 + $0x3b8] sm:$0xff] }
 0x15a   : > { %743 = vmatprep.mubr.f32.mxu1 %v652_v17 }
 0x15d   : > { %744 = vmatmul.mubr.f32.gmra.mrb[4].mxu1 %v651_v0 }
 0x15e   : > { %748 = vmatprep.mubr.f32.mxu1 %v655_v20 }
 0x161   : > { %749 = vmatmul.mubr.f32.gmra.mrb[6].mxu1 %v654_v49 }
 0x162   : > { %753 = vmatprep.mubr.f32.mxu1 %v658_v22 }
 0x165   : > { %754 = vmatmul.mubr.f32.gmra.mrb[8].mxu1 %v657_v12 }
 0x166   : > { %758 = vmatprep.mubr.f32.mxu1 %v661_v23 }
 0x169   : > { %759 = vmatmul.mubr.f32.gmra.mrb[10].mxu1 %v660_v21  ;;  %v4257_v21 = vmov 0.0  }
 0x16a   : > { %763 = vmatprep.mubr.f32.mxu1 %v664_v24  ;;  %3814 = vmatprep.mubr.msk.f32.mxu0 %vm4256_vm2, %v4257_v21  ;;  %v918_v24 = vld [vmem:[#allocation2 + $0x420] sm:$0xff] }
 0x16b   : > { %3815 = vmatmul.mubr.msk.f32.vlgmr.msra.gmra.mrb[32].mxu0 %vm323_vm0, %v918_v24 }
 0x16c   : > { %3817 = vmatprep.mubr.msk.f32.mxu0 %vm4256_vm2, %v4257_v21 }
 0x16d   : > { %764 = vmatmul.mubr.f32.gmra.mrb[12].mxu1 %v663_v25  ;;  %v919_v25 = vld [vmem:[#allocation2 + $0x438] sm:$0xff] }
 0x16e   : > { %768 = vmatprep.mubr.f32.mxu1 %v667_v27  ;;  %v920_v27 = vld [vmem:[#allocation2 + $0x450] sm:$0xf] }
 0x16f   : > { %3818 = vmatmul.mubr.msk.f32.gmra.mrb[34].mxu0 %vm323_vm0, %v919_v25 }
 0x170   : > { %3820 = vmatprep.mubr.msk.f32.mxu0 %vm4256_vm2, %v4257_v21 }
 0x171   : > { %769 = vmatmul.mubr.f32.gmra.mrb[14].mxu1 %v666_v28 }
 0x172   : > { %3800 = vmatprep.mubr.msk.f32.mxu1 %vm802_vm1, %v782_v29 }
 0x173   : > { %3821 = vmatmul.mubr.msk.f32.gmra.mrb[36].mxu0 %vm323_vm0, %v920_v27 }
 0x1a8   : > { %v793_v28 = vpop.permute.xlu0 %792 }
 0x228   : > { %v3629_v42 = vpop.f32.mrb[0].mxu1 }
 0x229   : > { %v3630_v34 = vpop.f32.mrb[1].mxu1 }
 0x22a   : > { %v3631_v36 = vadd.f32 %v3630_v34, %v3629_v42  ;;  %v795_v34 = vpop.permute.xlu1 %794 }
 0x22c   : > { %v3632_v37 = vpop.f32.mrb[2].mxu1  ;;  %v736_v43 = vadd.f32 %v3631_v36, %v647_v39 }
 0x22d   : > { %v3633_v40 = vpop.f32.mrb[3].mxu1 }
 0x22e   : > { %v3634_v44 = vadd.f32 %v3633_v40, %v3632_v37  ;;  %v774_v47 = vmax.f32 %v736_v43, 0.0 }
 0x230   : > { %v741_v45 = vadd.f32 %v3634_v44, %v650_v38  ;;  %v3635_v46 = vpop.f32.mrb[4].mxu1  ;;  %v4261_v44 = vmov 0  }
 0x231   : > { %v3636_v53 = vpop.f32.mrb[5].mxu1  ;;  %4084 = vset.pattern.permute.xlu0 %v4261_v44  ;;  %4083 = vset.pattern.permute.xlu1 %v4261_v44 }
 0x232   : > { %v775_v54 = vmax.f32 %v741_v45, 0.0  ;;  %v3637_v11 = vadd.f32 %v3636_v53, %v3635_v46 }
 0x234   : > { %v3638_v48 = vpop.f32.mrb[6].mxu1  ;;  %v3979_v62 = vpack.c.bf16 %v775_v54, %v774_v47  ;;  %v746_v63 = vadd.f32 %v3637_v11, %v653_v61  ;;  %v791_v61 = vpop.permute.xlu1 %790 }
 0x235   : > { %v3639_v51 = vpop.f32.mrb[7].mxu1 }
 0x236   : > { %v3640_v19 = vadd.f32 %v3639_v51, %v3638_v48  ;;  %3980 = vmatprep.subr.bf16.mxu1 %v3979_v62  ;;  %v776_v5 = vmax.f32 %v746_v63, 0.0 }
 0x237   : > { %3982 = vmatpush3.bf16.msra.mxu1 %v3979_v62 }
 0x238   : > { %v751_v58 = vadd.f32 %v3640_v19, %v656_v57  ;;  %v3641_v52 = vpop.f32.mrb[8].mxu1 }
 0x239   : > { %v3642_v2 = vpop.f32.mrb[9].mxu1 }
 0x23a   : > { %v777_v55 = vmax.f32 %v751_v58, 0.0  ;;  %v3643_v7 = vadd.f32 %v3642_v2, %v3641_v52 }
 0x23c   : > { %v3644_v8 = vpop.f32.mrb[10].mxu1  ;;  %v3983_v56 = vpack.c.bf16 %v777_v55, %v776_v5  ;;  %v756_v59 = vadd.f32 %v3643_v7, %v659_v26 }
 0x23d   : > { %v3645_v1 = vpop.f32.mrb[11].mxu1 }
 0x23e   : > { %v3646_v10 = vadd.f32 %v3645_v1, %v3644_v8  ;;  %3984 = vmatprep.subr.bf16.mxu1 %v3983_v56  ;;  %v778_v14 = vmax.f32 %v756_v59, 0.0  ;;  %v1005_v45 = vpop.f32.mrb[32].mxu0  ;;  %v1130_v59 = vld [vmem:[#allocation2 + $0x468] sm:$0xff] }
 0x23f   : > { %3986 = vmatpush3.bf16.msra.mxu1 %v3983_v56  ;;  %v3816_v46 = vpop.f32.mrb[33].mxu0  ;;  %3840 = vmatprep.mubr.msk.f32.mxu0 %vm1142_vm7, %v1130_v59 }
 0x240   : > { %v761_v35 = vadd.f32 %v3646_v10, %v662_v9  ;;  %v3647_v13 = vpop.f32.mrb[12].mxu1  ;;  %v1131_v10 = vld [vmem:[#allocation2 + $0x480] sm:$0x3]  ;;  %v1317_v46 = vld [vmem:[#allocation2 + $0x528] sm:$0xff] }
 0x241   : > { %v3648_v60 = vpop.f32.mrb[13].mxu1 }
 0x242   : > { %v779_v4 = vmax.f32 %v761_v35, 0.0  ;;  %v3649_v15 = vadd.f32 %v3648_v60, %v3647_v13  ;;  %v1010_v53 = vpop.f32.mrb[34].mxu0  ;;  %v4263_v35 = vmov 20  }
 0x243   : > { %v3819_v47 = vpop.f32.mrb[35].mxu0 }
 0x244   : > { %v3650_v18 = vpop.f32.mrb[14].mxu1  ;;  %v3987_v16 = vpack.c.bf16 %v779_v4, %v778_v14  ;;  %v766_v0 = vadd.f32 %v3649_v15, %v665_v50  ;;  %v1319_v47 = vld [vmem:[#allocation2 + $0x558] sm:$0xff] }
 0x245   : > { %v3651_v17 = vpop.f32.mrb[15].mxu1 }
 0x246   : > { %v3652_v20 = vadd.f32 %v3651_v17, %v3650_v18  ;;  %3988 = vmatprep.subr.bf16.mxu1 %v3987_v16  ;;  %v780_v22 = vmax.f32 %v766_v0, 0.0  ;;  %v1015_v54 = vpop.f32.mrb[36].mxu0 }
 0x247   : > { %3990 = vmatpush3.bf16.msra.mxu1 %v3987_v16  ;;  %v3822_v11 = vpop.f32.mrb[37].mxu0 }
 0x248   : > { %v771_v49 = vadd.f32 %v3652_v20, %v668_v41 }
 0x24a   : > { %v781_v12 = vmax.f32 %v771_v49, 0.0 }
 0x24c   : > { %v3991_v23 = vpack.c.bf16 %v781_v12, %v780_v22 }
 0x24e   : > { %3992 = vmatprep.subr.bf16.mxu1 %v3991_v23 }
 0x24f   : > { %3994 = vmatpush3.bf16.msra.mxu1 %v3991_v23 }
 0x250   : > { %3823 = vmatprep.subr.mxu1 %v4257_v21 }
 0x252   : > { %3801 = vmatmul.mubr.msk.f32.vlgmr.msra.gmra.mrb[16].mxu1 %vm802_vm1, %v4489_v30 }
 0x253   : > { %3803 = vmatprep.mubr.msk.f32.mxu1 %vm802_vm1, %v4491_v31 }
 0x256   : > { %3804 = vmatmul.mubr.msk.f32.gmra.mrb[18].mxu1 %vm802_vm1, %v4499_v33  ;;  %v797_v33 = vpop.permute.xlu0 %796 }
 0x257   : > { %3825 = vmatprep.mubr.msk.f32.mxu1 %vm4256_vm2, %v4257_v21 }
 0x325   : > { %v3802_v29 = vpop.f32.mrb[16].mxu1 }
 0x326   : > { %v883_v30 = vadd.f32 %v3802_v29, %v793_v28  ;;  %v877_v31 = vpop.f32.mrb[17].mxu1 }
 0x327   : > { %v878_v48 = vadd.f32 %v877_v31, %v791_v61 }
 0x328   : > { %4106 = vtanh.f32 %v883_v30 }
 0x329   : > { %v3805_v42 = vpop.f32.mrb[18].mxu1 }
 0x32a   : > { %v893_v36 = vadd.f32 %v3805_v42, %v797_v33  ;;  %v887_v39 = vpop.f32.mrb[19].mxu1 }
 0x32b   : > { %v888_v37 = vadd.f32 %v887_v39, %v795_v34 }
 0x32c   : > { %4108 = vtanh.f32 %v893_v36  ;;  %v2548_v36 = vld [vmem:[#allocation2 + $0x7f8] sm:$0xff] }
 0x32d   : > { %4110 = vtanh.f32 %v888_v37  ;;  %v1312_v37 = vld [vmem:[#allocation2 + $0x4b0] sm:$0xff] }
 0x32e   : > { %4112 = vtanh.f32 %v878_v48 }
 0x332   : > { %v4107_v38 = vpop.eup %4106 }
 0x333   : > { %901 = vrot.lane.b32.xlu0 %v4107_v38, %s4258_s5  ;;  %v1313_v38 = vld [vmem:[#allocation2 + $0x4c8] sm:$0xff] }
 0x336   : > { %v4109_v40 = vpop.eup %4108 }
 0x337   : > { %v4111_v43 = vpop.eup %4110  ;;  %909 = vrot.lane.b32.xlu0 %v4109_v40, %s4259_s6  ;;  %v1314_v40 = vld [vmem:[#allocation2 + $0x4e0] sm:$0xff] }
 0x338   : > { %905 = vrot.lane.b32.xlu1 %v4111_v43, %s4260_s7  ;;  %v4113_v57 = vpop.eup %4112  ;;  %v4266_v43 = vmov 5  }
 0x33b   : > { %1036 = vrot.lane.b32.xlu0 %v919_v25, %s4253_s3 }
 0x33c   : > { %1034 = vrot.lane.b32.xlu1 %v918_v24, %s4253_s3 }
 0x33f   : > { %924 = vrot.lane.b32.xlu0 %v918_v24, %s4262_s8  ;;  %v1228_v24 = vld [vmem:[#allocation2 + $0x498] sm:$0x1f] }
 0x340   : > { %1038 = vrot.lane.b32.xlu1 %v920_v27, %s4253_s3 }
 0x343   : > { %928 = vrot.lane.b32.xlu0 %v920_v27, %s4262_s8 }
 0x344   : > { %926 = vrot.lane.b32.xlu1 %v919_v25, %s4262_s8  ;;  %v4264_v25 = vmov 10  }
 0x3a5   : > { %v902_v62 = vpop.permute.xlu0 %901 }
 0x3a6   : > { %v913_v63 = vsel %vm912_vm3, %v4113_v57, %v902_v62  ;;  %vm1525_vm3 = vcmask 97280  }
 0x3a9   : > { %v910_v51 = vpop.permute.xlu0 %909 }
 0x3aa   : > { %v906_v19 = vpop.permute.xlu1 %905 }
 0x3ab   : > { %v915_v58 = vsel %vm914_vm4, %v913_v63, %v906_v19  ;;  %v1535_v63 = vld [vmem:[#allocation2 + $0x588] sm:$0xff]  ;;  %v1536_v19 = vld [vmem:[#allocation2 + $0x5a0] sm:$0xf]  ;;  %vm1527_vm4 = vcmask 130048  }
 0x3ac   : > { %v917_v52 = vsel %vm916_vm5, %v915_v58, %v910_v51  ;;  %v1534_v51 = vld [vmem:[#allocation2 + $0x570] sm:$0xff]  ;;  %vm1530_vm5 = vcmask 195584  }
 0x3ad   : > { %3824 = vmatpush3.msra.mxu1 %v917_v52  ;;  %v1037_v2 = vpop.permute.xlu0 %1036 }
 0x3ae   : > { %v1035_v5 = vpop.permute.xlu1 %1034  ;;  %4005 = vmatprep.subr.bf16.mxu1 %v4255_v32 }
 0x3af   : > { %3826 = vmatmul.mubr.msk.f32.vlgmr.msra.gmra.mrb[20].mxu1 %vm1040_vm6, %v1035_v5 }
 0x3b0   : > { %3828 = vmatprep.mubr.msk.f32.mxu1 %vm4256_vm2, %v4257_v21 }
 0x3b1   : > { %v925_v55 = vpop.permute.xlu0 %924 }
 0x3b2   : > { %v1039_v7 = vpop.permute.xlu1 %1038  ;;  %v1006_v26 = vadd.f32 %v1005_v45, %v925_v55  ;;  %v1315_v45 = vld [vmem:[#allocation2 + $0x4f8] sm:$0xff] }
 0x3b3   : > { %3829 = vmatmul.mubr.msk.f32.gmra.mrb[22].mxu1 %vm1040_vm6, %v1037_v2 }
 0x3b4   : > { %3831 = vmatprep.mubr.msk.f32.mxu1 %vm4256_vm2, %v4257_v21  ;;  %1021 = vperm.xlu1 %4083, %v1006_v26  }
 0x3b5   : > { %v929_v8 = vpop.permute.xlu0 %928 }
 0x3b6   : > { %v1016_v56 = vadd.f32 %v1015_v54, %v929_v8  ;;  %v927_v9 = vpop.permute.xlu1 %926  ;;  %v1318_v54 = vld [vmem:[#allocation2 + $0x540] sm:$0xff] }
 0x3b7   : > { %3832 = vmatmul.mubr.msk.f32.gmra.mrb[24].mxu1 %vm1040_vm6, %v1039_v7  ;;  %v1011_v1 = vadd.f32 %v1010_v53, %v927_v9  ;;  %v1316_v53 = vld [vmem:[#allocation2 + $0x510] sm:$0xff] }
 0x3b8   : > { %1031 = vperm.xlu1 %4083, %v1016_v56   ;;  %3847 = vmatprep.mubr.msk.f32.mxu1 %vm4256_vm2, %v4257_v21 }
 0x3b9   : > { %1026 = vperm.xlu0 %4084, %v1011_v1  }
 0x3bc   : > { %4085 = vset.pattern.permute.xlu1 %v4263_v35 }
 0x3bd   : > { %4086 = vset.pattern.permute.xlu0 %v4263_v35  ;;  %1134 = vperm.xlu1 %4085, %v1130_v59  }
 0x3be   : > { %1139 = vperm.xlu0 %4086, %v1131_v10  }
 0x3c1   : > { %4087 = vset.pattern.permute.xlu1 %v4264_v25 }
 0x3c2   : > { %1231 = vperm.xlu1 %4087, %v1228_v24   ;;  %4089 = vset.pattern.permute.xlu0 %v4266_v43 }
 0x3c3   : > { %1332 = vperm.xlu0 %4089, %v1314_v40  }
 0x3c6   : > { %4088 = vset.pattern.permute.xlu1 %v4266_v43 }
 0x3c7   : > { %1327 = vperm.xlu1 %4088, %v1313_v38   ;;  %1347 = vperm.xlu0 %4089, %v1317_v46  }
 0x3cb   : > { %1337 = vperm.xlu1 %4088, %v1315_v45   ;;  %1357 = vperm.xlu0 %4089, %v1319_v47  }
 0x3cf   : > { %1342 = vperm.xlu1 %4088, %v1316_v53   ;;  %4091 = vset.pattern.permute.xlu0 %v4261_v44 }
 0x3d3   : > { %1352 = vperm.xlu1 %4088, %v1318_v54  }
 0x3d7   : > { %1322 = vperm.xlu1 %4088, %v1312_v37  }
 0x3db   : > { %4090 = vset.pattern.permute.xlu1 %v4261_v44 }
 0x433   : > { %v1022_v13 = vpop.permute.xlu1 %1021 }
 0x437   : > { %v1032_v0 = vpop.permute.xlu1 %1031 }
 0x438   : > { %v1027_v4 = vpop.permute.xlu0 %1026 }
 0x43c   : > { %v1135_v28 = vpop.permute.xlu1 %1134 }
 0x43d   : > { %v1140_v27 = vpop.permute.xlu0 %1139 }
 0x441   : > { %v1232_v11 = vpop.permute.xlu1 %1231 }
 0x442   : > { %v1333_v52 = vpop.permute.xlu0 %1332 }
 0x446   : > { %v1328_v58 = vpop.permute.xlu1 %1327  ;;  %v1348_v9 = vpop.permute.xlu0 %1347 }
 0x44a   : > { %v1338_v5 = vpop.permute.xlu1 %1337 }
 0x44e   : > { %v1343_v59 = vpop.permute.xlu1 %1342 }
 0x482   : > { %v1113_v60 = vpop.f32.mrb[20].mxu1 }
 0x483   : > { %v3827_v14 = vpop.f32.mrb[21].mxu1  ;;  %v1114_v15 = vadd.f32 %v1113_v60, %v1022_v13 }
 0x485   : > { %v1127_v41 = vmax.f32 %v1114_v15, 0.0 }
 0x486   : > { %v1118_v50 = vpop.f32.mrb[22].mxu1 }
 0x487   : > { %v1119_v18 = vadd.f32 %v1118_v50, %v1027_v4  ;;  %v3830_v16 = vpop.f32.mrb[23].mxu1  ;;  %v1358_v4 = vpop.permute.xlu0 %1357 }
 0x489   : > { %v1128_v17 = vmax.f32 %v1119_v18, 0.0  ;;  %v1353_v18 = vpop.permute.xlu1 %1352 }
 0x48a   : > { %v1123_v20 = vpop.f32.mrb[24].mxu1 }
 0x48b   : > { %v4001_v49 = vpack.c.bf16 %v1128_v17, %v1127_v41  ;;  %v1124_v22 = vadd.f32 %v1123_v20, %v1032_v0  ;;  %v3833_v12 = vpop.f32.mrb[25].mxu1 }
 0x48d   : > { %v1129_v23 = vmax.f32 %v1124_v22, 0.0  ;;  %4002 = vmatprep.subr.bf16.mxu0 %v4001_v49 }
 0x48e   : > { %4004 = vmatpush3.bf16.msra.mxu0 %v4001_v49 }
 0x48f   : > { %3838 = vmatprep.subr.msk.mxu0 %vm1147_vm8, %v1129_v23 }
 0x492   : > { %3839 = vmatpush3.msk.msra.mxu0 %vm1147_vm8, %v1129_v23 }
 0x493   : > { %3841 = vmatmul.mubr.msk.f32.vlgmr.msra.gmra.mrb[38].mxu0 %vm1142_vm7, %v1131_v10 }
 0x494   : > { %3852 = vmatprep.mubr.msk.f32.mxu0 %vm1360_vm13, %v1312_v37 }
 0x566   : > { %v3842_v29 = vpop.f32.mrb[38].mxu0 }
 0x567   : > { %v1223_v30 = vadd.f32 %v3842_v29, %v1140_v27  ;;  %v1217_v31 = vpop.f32.mrb[39].mxu0 }
 0x568   : > { %v1218_v33 = vadd.f32 %v1217_v31, %v1135_v28 }
 0x569   : > { %v1227_v42 = vmax.f32 %v1223_v30, 0.0 }
 0x56a   : > { %v1226_v34 = vmax.f32 %v1218_v33, 0.0  ;;  %v1323_v33 = vpop.permute.xlu1 %1322 }
 0x56c   : > { %v4006_v39 = vpack.c.bf16 %v1227_v42, %v1226_v34 }
 0x56e   : > { %4008 = vmatpush3.bf16.msk.msra.mxu1 %vm4549_vm11, %v4006_v39 }
 0x56f   : > { %4009 = vmatprep.subr.bf16.mxu1 %v4255_v32 }
 0x571   : > { %3848 = vmatmul.mubr.msk.f32.vlgmr.msra.gmra.mrb[26].mxu1 %vm1234_vm12, %v1228_v24 }
 0x572   : > { %4011 = vmatpush3.bf16.msra.mxu1 %v4344_v3  ;;  %3872 = vmatprep.mubr.msk.f32.mxu1 %vm4256_vm2, %v4257_v21 }
 0x573   : > { %4012 = vmatprep.subr.bf16.mxu1 %v4255_v32 }
 0x576   : > { %4014 = vmatpush3.bf16.msra.mxu1 %v4346_v6 }
 0x579   : > { %3873 = vmatmul.mubr.msk.f32.vlgmr.msra.gmra.mrb[28].mxu1 %vm323_vm0, %v1534_v51 }
 0x57a   : > { %3875 = vmatprep.mubr.msk.f32.mxu1 %vm4256_vm2, %v4257_v21 }
 0x57d   : > { %3876 = vmatmul.mubr.msk.f32.gmra.mrb[30].mxu1 %vm323_vm0, %v1535_v63 }
 0x57e   : > { %3878 = vmatprep.mubr.msk.f32.mxu1 %vm4256_vm2, %v4257_v21 }
 0x581   : > { %3879 = vmatmul.mubr.msk.f32.gmra.mrb[32].mxu1 %vm323_vm0, %v1536_v19 }
 0x644   : > { %v1307_v61 = vpop.f32.mrb[26].mxu1 }
 0x645   : > { %v1308_v48 = vadd.f32 %v1307_v61, %v1232_v11  ;;  %v3849_v62 = vpop.f32.mrb[27].mxu1 }
 0x647   : > { %v1311_v57 = vmax.f32 %v1308_v48, 0.0 }
 0x649   : > { %3850 = vmatprep.subr.msk.mxu0 %vm1377_vm14, %v1311_v57 }
 0x64a   : > { %3851 = vmatpush3.msk.msra.mxu0 %vm1377_vm14, %v1311_v57 }
 0x64b   : > { %3853 = vmatmul.mubr.msk.f32.vlgmr.msra.gmra.mrb[40].mxu0 %vm1360_vm13, %v1313_v38  ;;  %3881 = vmatprep.subr.mxu0 %v4257_v21 }
 0x64c   : > { %3855 = vmatprep.mubr.msk.f32.mxu0 %vm1360_vm13, %v1314_v40  ;;  %v1621_v24 = vpop.f32.mrb[28].mxu1 }
 0x64d   : > { %v3874_v27 = vpop.f32.mrb[29].mxu1 }
 0x64f   : > { %3856 = vmatmul.mubr.msk.f32.gmra.mrb[42].mxu0 %vm1360_vm13, %v1315_v45 }
 0x650   : > { %3858 = vmatprep.mubr.msk.f32.mxu0 %vm1360_vm13, %v1316_v53  ;;  %v1626_v28 = vpop.f32.mrb[30].mxu1 }
 0x651   : > { %v3877_v29 = vpop.f32.mrb[31].mxu1 }
 0x652   : > { %v1924_v29 = vld [vmem:[#allocation2 + $0x618] sm:$0xff] }
 0x653   : > { %3859 = vmatmul.mubr.msk.f32.gmra.mrb[44].mxu0 %vm1360_vm13, %v1317_v46 }
 0x654   : > { %3861 = vmatprep.mubr.msk.f32.mxu0 %vm1360_vm13, %v1318_v54  ;;  %v1631_v30 = vpop.f32.mrb[32].mxu1 }
 0x655   : > { %v3880_v31 = vpop.f32.mrb[33].mxu1 }
 0x656   : > { %v1929_v31 = vld [vmem:[#allocation2 + $0x690] sm:$0xff] }
 0x657   : > { %3862 = vmatmul.mubr.msk.f32.gmra.mrb[46].mxu0 %vm1360_vm13, %v1319_v47 }
 0x658   : > { %3883 = vmatprep.mubr.msk.f32.mxu0 %vm4256_vm2, %v4257_v21 }
 0x71e   : > { %v3854_v2 = vpop.f32.mrb[40].mxu0 }
 0x71f   : > { %v1453_v55 = vadd.f32 %v3854_v2, %v1328_v58  ;;  %v1447_v7 = vpop.f32.mrb[41].mxu0 }
 0x720   : > { %v1448_v42 = vadd.f32 %v1447_v7, %v1323_v33  ;;  %v1930_v33 = vld [vmem:[#allocation2 + $0x6a8] sm:$0xff] }
 0x721   : > { %4114 = vtanh.f32 %v1453_v55 }
 0x722   : > { %v3857_v26 = vpop.f32.mrb[42].mxu0 }
 0x723   : > { %v1463_v8 = vadd.f32 %v3857_v26, %v1338_v5  ;;  %v1457_v56 = vpop.f32.mrb[43].mxu0  ;;  %v1746_v26 = vld [vmem:[#allocation2 + $0x5d0] sm:$0x3] }
 0x724   : > { %v1458_v1 = vadd.f32 %v1457_v56, %v1333_v52 }
 0x725   : > { %4116 = vtanh.f32 %v1463_v8 }
 0x726   : > { %4118 = vtanh.f32 %v1458_v1  ;;  %v3860_v10 = vpop.f32.mrb[44].mxu0 }
 0x727   : > { %v1473_v13 = vadd.f32 %v3860_v10, %v1348_v9  ;;  %v1467_v60 = vpop.f32.mrb[45].mxu0 }
 0x728   : > { %v1468_v14 = vadd.f32 %v1467_v60, %v1343_v59 }
 0x729   : > { %4120 = vtanh.f32 %v1473_v13 }
 0x72a   : > { %4122 = vtanh.f32 %v1468_v14  ;;  %v3863_v15 = vpop.f32.mrb[46].mxu0 }
 0x72b   : > { %v4115_v50 = vpop.eup %4114  ;;  %v1483_v16 = vadd.f32 %v3863_v15, %v1358_v4  ;;  %v1477_v41 = vpop.f32.mrb[47].mxu0 }
 0x72c   : > { %v1478_v17 = vadd.f32 %v1477_v41, %v1353_v18  ;;  %1495 = vrot.lane.b32.xlu0 %v4115_v50, %s4267_s11 }
 0x72d   : > { %4124 = vtanh.f32 %v1483_v16 }
 0x72e   : > { %4126 = vtanh.f32 %v1478_v17  ;;  %v1841_v17 = vld [vmem:[#allocation2 + $0x5e8] sm:$0x1f] }
 0x72f   : > { %v4117_v0 = vpop.eup %4116  ;;  %4128 = vtanh.f32 %v1448_v42  ;;  %v1925_v42 = vld [vmem:[#allocation2 + $0x630] sm:$0xff] }
 0x730   : > { %v4119_v20 = vpop.eup %4118  ;;  %1503 = vrot.lane.b32.xlu0 %v4117_v0, %s4268_s12 }
 0x731   : > { %1499 = vrot.lane.b32.xlu1 %v4119_v20, %s4269_s13 }
 0x733   : > { %v4121_v49 = vpop.eup %4120 }
 0x734   : > { %v4123_v22 = vpop.eup %4122  ;;  %1511 = vrot.lane.b32.xlu0 %v4121_v49, %s4270_s14 }
 0x735   : > { %1507 = vrot.lane.b32.xlu1 %v4123_v22, %s4271_s15 }
 0x737   : > { %v4125_v12 = vpop.eup %4124 }
 0x738   : > { %v4127_v23 = vpop.eup %4126  ;;  %1519 = vrot.lane.b32.xlu0 %v4125_v12, %s4272_s16 }
 0x739   : > { %1515 = vrot.lane.b32.xlu1 %v4127_v23, %s4273_s17  ;;  %v4129_v39 = vpop.eup %4128 }
 0x73c   : > { %1652 = vrot.lane.b32.xlu0 %v1535_v63, %s4253_s3 }
 0x73d   : > { %1650 = vrot.lane.b32.xlu1 %v1534_v51, %s4253_s3 }
 0x740   : > { %1540 = vrot.lane.b32.xlu0 %v1534_v51, %s4262_s8 }
 0x741   : > { %1654 = vrot.lane.b32.xlu1 %v1536_v19, %s4253_s3 }
 0x744   : > { %1544 = vrot.lane.b32.xlu0 %v1536_v19, %s4262_s8 }
 0x745   : > { %1542 = vrot.lane.b32.xlu1 %v1535_v63, %s4262_s8 }
 0x79e   : > { %v1496_v34 = vpop.permute.xlu0 %1495 }
 0x79f   : > { %v1523_v38 = vsel %vm1522_vm15, %v4129_v39, %v1496_v34  ;;  %v1927_v34 = vld [vmem:[#allocation2 + $0x660] sm:$0xff]  ;;  %v1926_v39 = vld [vmem:[#allocation2 + $0x648] sm:$0xff] }
 0x7a2   : > { %v1504_v37 = vpop.permute.xlu0 %1503 }
 0x7a3   : > { %v1500_v40 = vpop.permute.xlu1 %1499 }
 0x7a4   : > { %v1524_v45 = vsel %vm1040_vm6, %v1523_v38, %v1500_v40 }
 0x7a5   : > { %v1526_v47 = vsel %vm1525_vm3, %v1524_v45, %v1504_v37 }
 0x7a6   : > { %v1512_v46 = vpop.permute.xlu0 %1511 }
 0x7a7   : > { %v1508_v53 = vpop.permute.xlu1 %1507 }
 0x7a8   : > { %v1528_v54 = vsel %vm1527_vm4, %v1526_v47, %v1508_v53  ;;  %v2135_v53 = vld [vmem:[#allocation2 + $0x6d8] sm:$0xff]  ;;  %v2136_v47 = vld [vmem:[#allocation2 + $0x6f0] sm:$0xf] }
 0x7a9   : > { %v1529_v48 = vsel %vm1142_vm7, %v1528_v54, %v1512_v46 }
 0x7aa   : > { %v1520_v11 = vpop.permute.xlu0 %1519 }
 0x7ab   : > { %v1516_v61 = vpop.permute.xlu1 %1515 }
 0x7ac   : > { %v1531_v62 = vsel %vm1530_vm5, %v1529_v48, %v1516_v61 }
 0x7ad   : > { %v1533_v57 = vsel %vm1532_vm9, %v1531_v62, %v1520_v11 }
 0x7ae   : > { %3882 = vmatpush3.msra.mxu0 %v1533_v57  ;;  %v1653_v51 = vpop.permute.xlu0 %1652 }
 0x7af   : > { %v1651_v63 = vpop.permute.xlu1 %1650  ;;  %4023 = vmatprep.subr.bf16.mxu0 %v4255_v32 }
 0x7b0   : > { %3884 = vmatmul.mubr.msk.f32.vlgmr.msra.gmra.mrb[48].mxu0 %vm1040_vm6, %v1651_v63 }
 0x7b1   : > { %3886 = vmatprep.mubr.msk.f32.mxu0 %vm4256_vm2, %v4257_v21  ;;  %4025 = vmatpush3.bf16.msra.mxu0 %v4344_v3  ;;  %v1745_v3 = vld [vmem:[#allocation2 + $0x5b8] sm:$0xff] }
 0x7b2   : > { %v1541_v19 = vpop.permute.xlu0 %1540  ;;  %4026 = vmatprep.subr.bf16.mxu0 %v4255_v32  ;;  %3898 = vmatprep.mubr.msk.f32.mxu1 %vm1142_vm7, %v1745_v3 }
 0x7b3   : > { %v1655_v58 = vpop.permute.xlu1 %1654  ;;  %v1622_v52 = vadd.f32 %v1621_v24, %v1541_v19 }
 0x7b4   : > { %3887 = vmatmul.mubr.msk.f32.gmra.mrb[50].mxu0 %vm1040_vm6, %v1653_v51 }
 0x7b5   : > { %3889 = vmatprep.mubr.msk.f32.mxu0 %vm4256_vm2, %v4257_v21  ;;  %1637 = vperm.xlu1 %4090, %v1622_v52  }
 0x7b6   : > { %v1545_v2 = vpop.permute.xlu0 %1544  ;;  %4028 = vmatpush3.bf16.msra.mxu0 %v4346_v6 }
 0x7b7   : > { %v1543_v5 = vpop.permute.xlu1 %1542  ;;  %v1632_v55 = vadd.f32 %v1631_v30, %v1545_v2  ;;  %v1928_v30 = vld [vmem:[#allocation2 + $0x678] sm:$0xff] }
 0x7b8   : > { %3890 = vmatmul.mubr.msk.f32.gmra.mrb[52].mxu0 %vm1040_vm6, %v1655_v58  ;;  %v1627_v7 = vadd.f32 %v1626_v28, %v1543_v5 }
 0x7b9   : > { %1647 = vperm.xlu1 %4090, %v1632_v55   ;;  %3930 = vmatprep.mubr.msk.f32.mxu0 %vm4256_vm2, %v4257_v21 }
 0x7ba   : > { %1642 = vperm.xlu0 %4091, %v1627_v7  }
 0x7bd   : > { %4092 = vset.pattern.permute.xlu1 %v4263_v35 }
 0x7be   : > { %4093 = vset.pattern.permute.xlu0 %v4263_v35  ;;  %1749 = vperm.xlu1 %4092, %v1745_v3  }
 0x7bf   : > { %1754 = vperm.xlu0 %4093, %v1746_v26  }
 0x7c2   : > { %4094 = vset.pattern.permute.xlu1 %v4264_v25 }
 0x7c3   : > { %4096 = vset.pattern.permute.xlu0 %v4266_v43  ;;  %1844 = vperm.xlu1 %4094, %v1841_v17  }
 0x7c4   : > { %1938 = vperm.xlu0 %4096, %v1924_v29  }
 0x7c7   : > { %4095 = vset.pattern.permute.xlu1 %v4266_v43 }
 0x7c8   : > { %1958 = vperm.xlu1 %4095, %v1928_v30   ;;  %1968 = vperm.xlu0 %4096, %v1930_v33  }
 0x7cc   : > { %1963 = vperm.xlu1 %4095, %v1929_v31   ;;  %1953 = vperm.xlu0 %4096, %v1927_v34  }
 0x7d0   : > { %1943 = vperm.xlu1 %4095, %v1925_v42   ;;  %4097 = vset.pattern.permute.xlu0 %v4261_v44 }
 0x7d4   : > { %1948 = vperm.xlu1 %4095, %v1926_v39  }
 0x834   : > { %v1638_v8 = vpop.permute.xlu1 %1637 }
 0x838   : > { %v1648_v4 = vpop.permute.xlu1 %1647 }
 0x839   : > { %v1643_v9 = vpop.permute.xlu0 %1642 }
 0x83d   : > { %v1750_v20 = vpop.permute.xlu1 %1749 }
 0x83e   : > { %v1755_v0 = vpop.permute.xlu0 %1754 }
 0x842   : > { %v1845_v37 = vpop.permute.xlu1 %1844 }
 0x843   : > { %v1939_v61 = vpop.permute.xlu0 %1938 }
 0x847   : > { %v1959_v54 = vpop.permute.xlu1 %1958  ;;  %v1969_v3 = vpop.permute.xlu0 %1968 }
 0x84b   : > { %v1964_v11 = vpop.permute.xlu1 %1963 }
 0x84f   : > { %v1944_v62 = vpop.permute.xlu1 %1943 }
 0x853   : > { %v1949_v52 = vpop.permute.xlu1 %1948 }
 0x883   : > { %v1728_v6 = vpop.f32.mrb[48].mxu0 }
 0x884   : > { %v3885_v56 = vpop.f32.mrb[49].mxu0  ;;  %v1729_v1 = vadd.f32 %v1728_v6, %v1638_v8 }
 0x886   : > { %v1742_v60 = vmax.f32 %v1729_v1, 0.0 }
 0x887   : > { %v1733_v59 = vpop.f32.mrb[50].mxu0 }
 0x888   : > { %v1734_v10 = vadd.f32 %v1733_v59, %v1643_v9  ;;  %v3888_v13 = vpop.f32.mrb[51].mxu0 }
 0x88a   : > { %v1743_v14 = vmax.f32 %v1734_v10, 0.0 }
 0x88b   : > { %v1738_v15 = vpop.f32.mrb[52].mxu0 }
 0x88c   : > { %v4015_v50 = vpack.c.bf16 %v1743_v14, %v1742_v60  ;;  %v1739_v18 = vadd.f32 %v1738_v15, %v1648_v4  ;;  %v3891_v16 = vpop.f32.mrb[53].mxu0 }
 0x88e   : > { %v1744_v41 = vmax.f32 %v1739_v18, 0.0  ;;  %4016 = vmatprep.subr.bf16.mxu1 %v4015_v50 }
 0x88f   : > { %4018 = vmatpush3.bf16.msra.mxu1 %v4015_v50 }
 0x890   : > { %3896 = vmatprep.subr.msk.mxu1 %vm1147_vm8, %v1744_v41 }
 0x893   : > { %3897 = vmatpush3.msk.msra.mxu1 %vm1147_vm8, %v1744_v41 }
 0x894   : > { %3899 = vmatmul.mubr.msk.f32.vlgmr.msra.gmra.mrb[34].mxu1 %vm1142_vm7, %v1746_v26  ;;  %4019 = vmatprep.subr.bf16.mxu1 %v4255_v32  ;;  %v1923_v32 = vld [vmem:[#allocation2 + $0x600] sm:$0xff] }
 0x895   : > { %3905 = vmatprep.mubr.msk.f32.mxu1 %vm4256_vm2, %v4257_v21  ;;  %1933 = vperm.xlu1 %4095, %v1923_v32  }
 0x899   : > { %4098 = vset.pattern.permute.xlu1 %v4261_v44  ;;  %v2134_v44 = vld [vmem:[#allocation2 + $0x6c0] sm:$0xff] }
 0x89a   : > { %3931 = vmatmul.mubr.msk.f32.vlgmr.msra.gmra.mrb[54].mxu0 %vm323_vm0, %v2134_v44 }
 0x89b   : > { %3933 = vmatprep.mubr.msk.f32.mxu0 %vm4256_vm2, %v4257_v21 }
 0x89e   : > { %3934 = vmatmul.mubr.msk.f32.gmra.mrb[56].mxu0 %vm323_vm0, %v2135_v53 }
 0x89f   : > { %3936 = vmatprep.mubr.msk.f32.mxu0 %vm4256_vm2, %v4257_v21  ;;  %vm2129_vm2 = vcmask 785408  }
 0x8a2   : > { %3937 = vmatmul.mubr.msk.f32.gmra.mrb[58].mxu0 %vm323_vm0, %v2136_v47 }
 0x8a3   : > { %2326 = vmatprep.mubr.f32.mxu0 %v4257_v21 }
 0x914   : > { %v1934_v41 = vpop.permute.xlu1 %1933 }
 0x967   : > { %v3900_v49 = vpop.f32.mrb[34].mxu1 }
 0x968   : > { %v1836_v22 = vadd.f32 %v3900_v49, %v1755_v0  ;;  %v1830_v12 = vpop.f32.mrb[35].mxu1 }
 0x969   : > { %v1831_v23 = vadd.f32 %v1830_v12, %v1750_v20 }
 0x96a   : > { %v1840_v24 = vmax.f32 %v1836_v22, 0.0 }
 0x96b   : > { %v1839_v27 = vmax.f32 %v1831_v23, 0.0 }
 0x96d   : > { %v4020_v28 = vpack.c.bf16 %v1840_v24, %v1839_v27  ;;  %v2221_v14 = vpop.f32.mrb[54].mxu0 }
 0x96e   : > { %v3932_v4 = vpop.f32.mrb[55].mxu0 }
 0x96f   : > { %4022 = vmatpush3.bf16.msk.msra.mxu1 %vm4549_vm11, %v4020_v28 }
 0x971   : > { %v2226_v15 = vpop.f32.mrb[56].mxu0 }
 0x972   : > { %3906 = vmatmul.mubr.msk.f32.vlgmr.msra.gmra.mrb[36].mxu1 %vm1234_vm12, %v1841_v17  ;;  %v3935_v50 = vpop.f32.mrb[57].mxu0  ;;  %v1954_v17 = vpop.permute.xlu0 %1953 }
 0x973   : > { %3910 = vmatprep.mubr.msk.f32.mxu1 %vm1360_vm13, %v1923_v32 }
 0x975   : > { %v2231_v18 = vpop.f32.mrb[58].mxu0 }
 0x976   : > { %v3938_v16 = vpop.f32.mrb[59].mxu0 }
 0xa45   : > { %v1918_v38 = vpop.f32.mrb[36].mxu1 }
 0xa46   : > { %v1919_v40 = vadd.f32 %v1918_v38, %v1845_v37  ;;  %v3907_v45 = vpop.f32.mrb[37].mxu1 }
 0xa48   : > { %v1922_v46 = vmax.f32 %v1919_v40, 0.0 }
 0xa4a   : > { %3908 = vmatprep.subr.msk.mxu1 %vm1377_vm14, %v1922_v46 }
 0xa4b   : > { %3909 = vmatpush3.msk.msra.mxu1 %vm1377_vm14, %v1922_v46 }
 0xa4c   : > { %3911 = vmatmul.mubr.msk.f32.vlgmr.msra.gmra.mrb[38].mxu1 %vm1360_vm13, %v1924_v29 }
 0xa4d   : > { %3913 = vmatprep.mubr.msk.f32.mxu1 %vm1360_vm13, %v1925_v42 }
 0xa50   : > { %3914 = vmatmul.mubr.msk.f32.gmra.mrb[40].mxu1 %vm1360_vm13, %v1926_v39 }
 0xa51   : > { %3916 = vmatprep.mubr.msk.f32.mxu1 %vm1360_vm13, %v1927_v34 }
 0xa54   : > { %3917 = vmatmul.mubr.msk.f32.gmra.mrb[42].mxu1 %vm1360_vm13, %v1928_v30 }
 0xa55   : > { %3919 = vmatprep.mubr.msk.f32.mxu1 %vm1360_vm13, %v1929_v31 }
 0xa58   : > { %3920 = vmatmul.mubr.msk.f32.gmra.mrb[44].mxu1 %vm1360_vm13, %v1930_v33 }
 0xa59   : > { %2437 = vmatprep.mubr.f32.mxu1 %v4257_v21 }
 0xb1f   : > { %v3912_v48 = vpop.f32.mrb[38].mxu1 }
 0xb20   : > { %v2062_v57 = vadd.f32 %v3912_v48, %v1939_v61  ;;  %v2056_v51 = vpop.f32.mrb[39].mxu1 }
 0xb21   : > { %v2057_v49 = vadd.f32 %v2056_v51, %v1934_v41 }
 0xb22   : > { %4130 = vtanh.f32 %v2062_v57 }
 0xb23   : > { %v3915_v63 = vpop.f32.mrb[40].mxu1 }
 0xb24   : > { %v2066_v19 = vpop.f32.mrb[41].mxu1  ;;  %v2072_v2 = vadd.f32 %v3915_v63, %v1949_v52 }
 0xb25   : > { %v2067_v58 = vadd.f32 %v2066_v19, %v1944_v62 }
 0xb27   : > { %4132 = vtanh.f32 %v2067_v58  ;;  %v3918_v5 = vpop.f32.mrb[42].mxu1 }
 0xb28   : > { %v2082_v55 = vadd.f32 %v3918_v5, %v1959_v54  ;;  %v2076_v7 = vpop.f32.mrb[43].mxu1  ;;  %v2351_v54 = vld [vmem:[#allocation2 + $0x708] sm:$0xff] }
 0xb29   : > { %v2077_v20 = vadd.f32 %v2076_v7, %v1954_v17 }
 0xb2a   : > { %4134 = vtanh.f32 %v2082_v55 }
 0xb2b   : > { %4136 = vtanh.f32 %v2072_v2  ;;  %v3921_v26 = vpop.f32.mrb[44].mxu1 }
 0xb2c   : > { %v4131_v6 = vpop.eup %4130  ;;  %v2092_v8 = vadd.f32 %v3921_v26, %v1969_v3  ;;  %v2086_v56 = vpop.f32.mrb[45].mxu1 }
 0xb2d   : > { %2104 = vrot.lane.b32.xlu1 %v4131_v6, %s4274_s18  ;;  %v2087_v9 = vadd.f32 %v2086_v56, %v1964_v11  ;;  %v2352_v11 = vld [vmem:[#allocation2 + $0x720] sm:$0x3] }
 0xb2e   : > { %4138 = vtanh.f32 %v2092_v8 }
 0xb2f   : > { %4140 = vtanh.f32 %v2087_v9 }
 0xb30   : > { %4142 = vtanh.f32 %v2077_v20 }
 0xb31   : > { %v4133_v1 = vpop.eup %4132  ;;  %4144 = vtanh.f32 %v2057_v49 }
 0xb32   : > { %2108 = vrot.lane.b32.xlu1 %v4133_v1, %s4254_s4 }
 0xb34   : > { %v4135_v59 = vpop.eup %4134 }
 0xb35   : > { %v4137_v10 = vpop.eup %4136  ;;  %2116 = vrot.lane.b32.xlu0 %v4135_v59, %s4274_s18 }
 0xb36   : > { %2112 = vrot.lane.b32.xlu1 %v4137_v10, %s4253_s3  ;;  %v2454_v10 = vld [vmem:[#allocation2 + $0x738] sm:$0x1f] }
 0xb38   : > { %v4139_v13 = vpop.eup %4138 }
 0xb39   : > { %2124 = vrot.lane.b32.xlu0 %v4139_v13, %s4253_s3  ;;  %v4141_v60 = vpop.eup %4140 }
 0xb3a   : > { %2252 = vrot.lane.b32.xlu1 %v2135_v53, %s4253_s3  ;;  %v4143_v28 = vpop.eup %4142 }
 0xb3b   : > { %v4145_v32 = vpop.eup %4144 }
 0xb3d   : > { %2120 = vrot.lane.b32.xlu0 %v4141_v60, %s4254_s4 }
 0xb3e   : > { %2140 = vrot.lane.b32.xlu1 %v2134_v44, %s4262_s8 }
 0xb41   : > { %2250 = vrot.lane.b32.xlu0 %v2134_v44, %s4253_s3 }
 0xb42   : > { %2144 = vrot.lane.b32.xlu1 %v2136_v47, %s4262_s8 }
 0xb45   : > { %2254 = vrot.lane.b32.xlu0 %v2136_v47, %s4253_s3 }
 0xb49   : > { %2142 = vrot.lane.b32.xlu0 %v2135_v53, %s4262_s8 }
 0xb9f   : > { %v2105_v0 = vpop.permute.xlu1 %2104 }
 0xba0   : > { %v2127_v31 = vsel %vm323_vm0, %v4145_v32, %v2105_v0  ;;  %v2545_v32 = vld [vmem:[#allocation2 + $0x7b0] sm:$0xff] }
 0xba4   : > { %v2109_v22 = vpop.permute.xlu1 %2108 }
 0xba5   : > { %v2128_v34 = vsel %vm802_vm1, %v2127_v31, %v2109_v22 }
 0xba7   : > { %v2117_v12 = vpop.permute.xlu0 %2116 }
 0xba8   : > { %v2113_v23 = vpop.permute.xlu1 %2112  ;;  %v2131_v29 = vsel %vm323_vm0, %v4143_v28, %v2117_v12  ;;  %v2544_v28 = vld [vmem:[#allocation2 + $0x798] sm:$0xff] }
 0xba9   : > { %v2130_v38 = vsel %vm2129_vm2, %v2128_v34, %v2113_v23 }
 0xbab   : > { %v2125_v24 = vpop.permute.xlu0 %2124 }
 0xbac   : > { %v2253_v27 = vpop.permute.xlu1 %2252 }
 0xbaf   : > { %v2121_v30 = vpop.permute.xlu0 %2120 }
 0xbb0   : > { %v2132_v33 = vsel %vm802_vm1, %v2131_v29, %v2121_v30  ;;  %v2141_v42 = vpop.permute.xlu1 %2140  ;;  %v2546_v29 = vld [vmem:[#allocation2 + $0x7c8] sm:$0xff]  ;;  %v2547_v30 = vld [vmem:[#allocation2 + $0x7e0] sm:$0xff] }
 0xbb1   : > { %v2133_v39 = vsel %vm2129_vm2, %v2132_v33, %v2125_v24  ;;  %v2222_v37 = vadd.f32 %v2221_v14, %v2141_v42  ;;  %v2542_v24 = vld [vmem:[#allocation2 + $0x768] sm:$0xff] }
 0xbb2   : > { %2262 = vmatprep.subr.mxu0 %v2133_v39 }
 0xbb3   : > { %v2251_v40 = vpop.permute.xlu0 %2250  ;;  %2263 = vmatpush1.msra.mxu0 %v2130_v38  ;;  %2237 = vperm.xlu0 %4097, %v2222_v37  }
 0xbb4   : > { %3529 = vmatmul.mubr.msk.f32.vlgmr.msra.gmra.mrb[60].mxu0 %vm1040_vm6, %v2251_v40  ;;  %v2145_v44 = vpop.permute.xlu1 %2144  ;;  %v4697_v40 = vld [vmem:[#allocation2 + $0x810] sm:$0x7] }
 0xbb5   : > { %2332 = vmatprep.mubr.f32.mxu0 %v4257_v21  ;;  %v2232_v47 = vadd.f32 %v2231_v18, %v2145_v44 }
 0xbb7   : > { %v2255_v45 = vpop.permute.xlu0 %2254  ;;  %4099 = vset.pattern.permute.xlu0 %v4263_v35 }
 0xbb8   : > { %3530 = vmatmul.mubr.msk.f32.gmra.mrb[62].mxu0 %vm1040_vm6, %v2253_v27  ;;  %2355 = vperm.xlu0 %4099, %v2351_v54   ;;  %v2543_v27 = vld [vmem:[#allocation2 + $0x780] sm:$0xff] }
 0xbb9   : > { %2338 = vmatprep.mubr.f32.mxu0 %v4257_v21 }
 0xbbb   : > { %v2143_v46 = vpop.permute.xlu0 %2142 }
 0xbbc   : > { %3531 = vmatmul.mubr.msk.f32.gmra.mrb[64].mxu0 %vm1040_vm6, %v2255_v45  ;;  %v2227_v53 = vadd.f32 %v2226_v15, %v2143_v46  ;;  %4102 = vset.pattern.permute.xlu0 %v4266_v43  ;;  %v4275_v45 = vmov 8  }
 0xbbd   : > { %2675 = vmatprep.mubr.f32.mxu0 %v4257_v21 }
 0xbbe   : > { %2242 = vperm.xlu1 %4098, %v2227_v53  }
 0xbc2   : > { %2247 = vperm.xlu1 %4098, %v2232_v47  }
 0xbc6   : > { %4100 = vset.pattern.permute.xlu1 %v4263_v35 }
 0xbc7   : > { %2360 = vperm.xlu1 %4100, %v2352_v11  }
 0xbcb   : > { %4101 = vset.pattern.permute.xlu1 %v4264_v25 }
 0xbcc   : > { %2457 = vperm.xlu1 %4101, %v2454_v10  }
 0xbd0   : > { %4103 = vset.pattern.permute.xlu1 %v4266_v43  ;;  %v2541_v43 = vld [vmem:[#allocation2 + $0x750] sm:$0xff] }
 0xbd1   : > { %2551 = vperm.xlu0 %4102, %v2541_v43   ;;  %2556 = vperm.xlu1 %4103, %v2542_v24  }
 0xbd5   : > { %2561 = vperm.xlu1 %4103, %v2543_v27   ;;  %2566 = vperm.xlu0 %4102, %v2544_v28  }
 0xbd9   : > { %2571 = vperm.xlu1 %4103, %v2545_v32   ;;  %2576 = vperm.xlu0 %4102, %v2546_v29  }
 0xbdd   : > { %2581 = vperm.xlu1 %4103, %v2547_v30   ;;  %2586 = vperm.xlu0 %4102, %v2548_v36  }
 0xbe1   : > { %4104 = vset.pattern.permute.xlu1 %v4275_v45  ;;  %4105 = vset.pattern.permute.xlu0 %v4275_v45 }
 0xbe2   : > { %2743 = vperm.xlu1 %4104, %v4697_v40  }
 0xc32   : > { %v2238_v48 = vpop.permute.xlu0 %2237 }
 0xc37   : > { %v2356_v60 = vpop.permute.xlu0 %2355 }
 0xc3d   : > { %v2243_v51 = vpop.permute.xlu1 %2242 }
 0xc41   : > { %v2248_v6 = vpop.permute.xlu1 %2247 }
 0xc46   : > { %v2361_v4 = vpop.permute.xlu1 %2360 }
 0xc4b   : > { %v2458_v31 = vpop.permute.xlu1 %2457 }
 0xc50   : > { %v2552_v46 = vpop.permute.xlu0 %2551 }
 0xc87   : > { %v2328_v61 = vpop.f32.mrb[60].mxu0 }
 0xc88   : > { %v2330_v62 = vpop.f32.mrb[61].mxu0  ;;  %v2329_v57 = vadd.f32 %v2328_v61, %v2238_v48 }
 0xc89   : > { %v2331_v63 = vadd.f32 %v2330_v62, %v2238_v48 }
 0xc8a   : > { %v2345_v5 = vmax.f32 %v2329_v57, 0.0 }
 0xc8b   : > { %v2334_v19 = vpop.f32.mrb[62].mxu0  ;;  %v2346_v55 = vmax.f32 %v2331_v63, 0.0 }
 0xc8c   : > { %v2335_v58 = vadd.f32 %v2334_v19, %v2243_v51  ;;  %v2336_v52 = vpop.f32.mrb[63].mxu0 }
 0xc8d   : > { %v2337_v2 = vadd.f32 %v2336_v52, %v2243_v51 }
 0xc8e   : > { %v2347_v35 = vmax.f32 %v2335_v58, 0.0 }
 0xc8f   : > { %v2348_v7 = vmax.f32 %v2337_v2, 0.0  ;;  %v2340_v3 = vpop.f32.mrb[64].mxu0  ;;  %v2567_v2 = vpop.permute.xlu0 %2566 }
 0xc90   : > { %v4031_v26 = vpack.c.bf16 %v2347_v35, %v2345_v5  ;;  %v2342_v8 = vpop.f32.mrb[65].mxu0  ;;  %v2341_v9 = vadd.f32 %v2340_v3, %v2248_v6 }
 0xc91   : > { %v4029_v56 = vpack.c.bf16 %v2348_v7, %v2346_v55  ;;  %v2343_v25 = vadd.f32 %v2342_v8, %v2248_v6 }
 0xc92   : > { %v2349_v59 = vmax.f32 %v2341_v9, 0.0 }
 0xc93   : > { %v2350_v1 = vmax.f32 %v2343_v25, 0.0  ;;  %4030 = vmatprep.subr.bf16.mxu1 %v4029_v56 }
 0xc94   : > { %4032 = vmatpush1.bf16.msra.mxu1 %v4031_v26 }
 0xc95   : > { %3532 = vmatprep.subr.msk.mxu1 %vm1147_vm8, %v2350_v1 }
 0xc98   : > { %3533 = vmatpush1.msk.msra.mxu1 %vm1147_vm8, %v2349_v59 }
 0xc99   : > { %3534 = vmatmul.mubr.msk.f32.vlgmr.msra.gmra.mrb[46].mxu1 %vm1142_vm7, %v2351_v54  ;;  %v2557_v54 = vpop.permute.xlu1 %2556 }
 0xc9a   : > { %2443 = vmatprep.mubr.f32.mxu1 %v4257_v21 }
 0xc9d   : > { %3535 = vmatmul.mubr.msk.f32.gmra.mrb[48].mxu1 %vm1142_vm7, %v2352_v11  ;;  %v2562_v51 = vpop.permute.xlu1 %2561 }
 0xc9e   : > { %2532 = vmatprep.mubr.f32.mxu1 %v4257_v21 }
 0xca1   : > { %v2572_v6 = vpop.permute.xlu1 %2571 }
 0xd6c   : > { %v2439_v13 = vpop.f32.mrb[46].mxu1 }
 0xd6d   : > { %v2441_v14 = vpop.f32.mrb[47].mxu1  ;;  %v2440_v15 = vadd.f32 %v2439_v13, %v2356_v60 }
 0xd6e   : > { %v2442_v50 = vadd.f32 %v2441_v14, %v2356_v60 }
 0xd6f   : > { %v2450_v0 = vmax.f32 %v2440_v15, 0.0 }
 0xd70   : > { %v2445_v18 = vpop.f32.mrb[48].mxu1  ;;  %v2451_v49 = vmax.f32 %v2442_v50, 0.0 }
 0xd71   : > { %v2446_v16 = vadd.f32 %v2445_v18, %v2361_v4  ;;  %v2447_v41 = vpop.f32.mrb[49].mxu1  ;;  %v2582_v18 = vpop.permute.xlu1 %2581 }
 0xd72   : > { %v2448_v17 = vadd.f32 %v2447_v41, %v2361_v4 }
 0xd73   : > { %v2452_v20 = vmax.f32 %v2446_v16, 0.0 }
 0xd74   : > { %v2453_v22 = vmax.f32 %v2448_v17, 0.0 }
 0xd75   : > { %v4036_v12 = vpack.c.bf16 %v2452_v20, %v2450_v0 }
 0xd76   : > { %v4033_v23 = vpack.c.bf16 %v2453_v22, %v2451_v49 }
 0xd78   : > { %4035 = vmatprep.subr.msk.bf16.mxu1 %vm4549_vm11, %v4033_v23 }
 0xd79   : > { %4038 = vmatpush1.bf16.msk.msra.mxu1 %vm4549_vm11, %v4036_v12 }
 0xd7c   : > { %3538 = vmatmul.mubr.msk.f32.vlgmr.msra.gmra.mrb[50].mxu1 %vm1234_vm12, %v2454_v10  ;;  %v2577_v10 = vpop.permute.xlu0 %2576 }
 0xd7d   : > { %2812 = vmatprep.mubr.f32.mxu1 %v4257_v21 }
 0xd80   : > { %v2587_v22 = vpop.permute.xlu0 %2586 }
 0xe4f   : > { %v2534_v33 = vpop.f32.mrb[50].mxu1 }
 0xe50   : > { %v2535_v42 = vadd.f32 %v2534_v33, %v2458_v31  ;;  %v2536_v34 = vpop.f32.mrb[51].mxu1 }
 0xe51   : > { %v2537_v39 = vadd.f32 %v2536_v34, %v2458_v31 }
 0xe52   : > { %v2539_v38 = vmax.f32 %v2535_v42, 0.0  ;;  %v4723_v42 = vpop.permute.xlu1 %2743 }
 0xe53   : > { %v2540_v37 = vmax.f32 %v2537_v39, 0.0 }
 0xe55   : > { %3539 = vmatprep.subr.msk.mxu0 %vm1377_vm14, %v2540_v37 }
 0xe56   : > { %3540 = vmatpush1.msk.msra.mxu0 %vm1377_vm14, %v2539_v38 }
 0xe57   : > { %3541 = vmatmul.mubr.msk.f32.vlgmr.msra.gmra.mrb[66].mxu0 %vm1360_vm13, %v2541_v43 }
 0xe58   : > { %2681 = vmatprep.mubr.f32.mxu0 %v4257_v21 }
 0xe5b   : > { %3542 = vmatmul.mubr.msk.f32.gmra.mrb[68].mxu0 %vm1360_vm13, %v2542_v24 }
 0xe5c   : > { %2687 = vmatprep.mubr.f32.mxu0 %v4257_v21 }
 0xe5f   : > { %3543 = vmatmul.mubr.msk.f32.gmra.mrb[70].mxu0 %vm1360_vm13, %v2543_v27 }
 0xe60   : > { %2693 = vmatprep.mubr.f32.mxu0 %v4257_v21 }
 0xe63   : > { %3544 = vmatmul.mubr.msk.f32.gmra.mrb[72].mxu0 %vm1360_vm13, %v2544_v28 }
 0xe64   : > { %2699 = vmatprep.mubr.f32.mxu0 %v4257_v21 }
 0xe67   : > { %3545 = vmatmul.mubr.msk.f32.gmra.mrb[74].mxu0 %vm1360_vm13, %v2545_v32 }
 0xe68   : > { %2705 = vmatprep.mubr.f32.mxu0 %v4257_v21 }
 0xe6b   : > { %3546 = vmatmul.mubr.msk.f32.gmra.mrb[76].mxu0 %vm1360_vm13, %v2546_v29 }
 0xe6c   : > { %2711 = vmatprep.mubr.f32.mxu0 %v4257_v21 }
 0xe6f   : > { %3547 = vmatmul.mubr.msk.f32.gmra.mrb[78].mxu0 %vm1360_vm13, %v2547_v30 }
 0xe70   : > { %2717 = vmatprep.mubr.f32.mxu0 %v4257_v21 }
 0xe73   : > { %3548 = vmatmul.mubr.msk.f32.gmra.mrb[80].mxu0 %vm1360_vm13, %v2548_v36 }
 0xf2a   : > { %v2677_v44 = vpop.f32.mrb[66].mxu0 }
 0xf2b   : > { %v2678_v53 = vadd.f32 %v2677_v44, %v2552_v46  ;;  %v2679_v47 = vpop.f32.mrb[67].mxu0 }
 0xf2c   : > { %v2680_v11 = vadd.f32 %v2679_v47, %v2552_v46 }
 0xf2e   : > { %4146 = vtanh.f32 %v2680_v11  ;;  %v2683_v61 = vpop.f32.mrb[68].mxu0 }
 0xf2f   : > { %4148 = vtanh.f32 %v2678_v53  ;;  %v2684_v48 = vadd.f32 %v2683_v61, %v2557_v54  ;;  %v2685_v62 = vpop.f32.mrb[69].mxu0 }
 0xf30   : > { %v2686_v57 = vadd.f32 %v2685_v62, %v2557_v54 }
 0xf32   : > { %4150 = vtanh.f32 %v2686_v57  ;;  %v2689_v63 = vpop.f32.mrb[70].mxu0 }
 0xf33   : > { %4152 = vtanh.f32 %v2684_v48  ;;  %v2690_v19 = vadd.f32 %v2689_v63, %v2562_v51  ;;  %v2691_v58 = vpop.f32.mrb[71].mxu0 }
 0xf34   : > { %v2692_v52 = vadd.f32 %v2691_v58, %v2562_v51 }
 0xf36   : > { %4154 = vtanh.f32 %v2692_v52  ;;  %v2695_v5 = vpop.f32.mrb[72].mxu0 }
 0xf37   : > { %4156 = vtanh.f32 %v2690_v19  ;;  %v2696_v35 = vadd.f32 %v2695_v5, %v2567_v2  ;;  %v2697_v55 = vpop.f32.mrb[73].mxu0 }
 0xf38   : > { %v4147_v7 = vpop.eup %4146  ;;  %v2698_v3 = vadd.f32 %v2697_v55, %v2567_v2 }
 0xf39   : > { %v4149_v26 = vpop.eup %4148  ;;  %2748 = vmatprep.subr.mxu1 %v4147_v7 }
 0xf3a   : > { %4158 = vtanh.f32 %v2698_v3  ;;  %v2701_v8 = vpop.f32.mrb[74].mxu0  ;;  %2749 = vmatpush1.msra.mxu1 %v4149_v26 }
 0xf3b   : > { %4160 = vtanh.f32 %v2696_v35  ;;  %v2702_v56 = vadd.f32 %v2701_v8, %v2572_v6  ;;  %v2703_v25 = vpop.f32.mrb[75].mxu0  ;;  %3549 = vmatmul.mubr.msk.f32.vlgmr.msra.gmra.mrb[52].mxu1 %vm1040_vm6, %v4697_v40 }
 0xf3c   : > { %v4151_v9 = vpop.eup %4150  ;;  %v2704_v1 = vadd.f32 %v2703_v25, %v2572_v6  ;;  %2883 = vmatprep.mubr.f32.mxu1 %v4257_v21 }
 0xf3d   : > { %v4153_v59 = vpop.eup %4152  ;;  %2819 = vmatprep.subr.mxu1 %v4151_v9 }
 0xf3e   : > { %4162 = vtanh.f32 %v2704_v1  ;;  %v2707_v13 = vpop.f32.mrb[76].mxu0  ;;  %2820 = vmatpush1.msra.mxu1 %v4153_v59 }
 0xf3f   : > { %4164 = vtanh.f32 %v2702_v56  ;;  %v2708_v60 = vadd.f32 %v2707_v13, %v2577_v10  ;;  %v2709_v14 = vpop.f32.mrb[77].mxu0  ;;  %3550 = vmatmul.mubr.msk.f32.vlgmr.msra.gmra.mrb[54].mxu1 %vm1040_vm6, %v4697_v40 }
 0xf40   : > { %v4155_v4 = vpop.eup %4154  ;;  %v2710_v15 = vadd.f32 %v2709_v14, %v2577_v10  ;;  %2954 = vmatprep.mubr.f32.mxu1 %v4257_v21 }
 0xf41   : > { %v4157_v50 = vpop.eup %4156  ;;  %2890 = vmatprep.subr.mxu1 %v4155_v4 }
 0xf42   : > { %4166 = vtanh.f32 %v2710_v15  ;;  %v2713_v16 = vpop.f32.mrb[78].mxu0  ;;  %2891 = vmatpush1.msra.mxu1 %v4157_v50 }
 0xf43   : > { %4168 = vtanh.f32 %v2708_v60  ;;  %v2714_v41 = vadd.f32 %v2713_v16, %v2582_v18  ;;  %v2715_v17 = vpop.f32.mrb[79].mxu0  ;;  %3551 = vmatmul.mubr.msk.f32.vlgmr.msra.gmra.mrb[56].mxu1 %vm1040_vm6, %v4697_v40 }
 0xf44   : > { %v4159_v0 = vpop.eup %4158  ;;  %v2716_v20 = vadd.f32 %v2715_v17, %v2582_v18  ;;  %3025 = vmatprep.mubr.f32.mxu1 %v4257_v21 }
 0xf45   : > { %v4161_v49 = vpop.eup %4160  ;;  %2961 = vmatprep.subr.mxu1 %v4159_v0 }
 0xf46   : > { %4170 = vtanh.f32 %v2716_v20  ;;  %v2719_v12 = vpop.f32.mrb[80].mxu0  ;;  %2962 = vmatpush1.msra.mxu1 %v4161_v49 }
 0xf47   : > { %4172 = vtanh.f32 %v2714_v41  ;;  %v2720_v23 = vadd.f32 %v2719_v12, %v2587_v22  ;;  %v2721_v43 = vpop.f32.mrb[81].mxu0  ;;  %3552 = vmatmul.mubr.msk.f32.vlgmr.msra.gmra.mrb[58].mxu1 %vm1040_vm6, %v4697_v40 }
 0xf48   : > { %v4163_v24 = vpop.eup %4162  ;;  %v2722_v27 = vadd.f32 %v2721_v43, %v2587_v22  ;;  %3096 = vmatprep.mubr.f32.mxu1 %v4257_v21 }
 0xf49   : > { %v4165_v28 = vpop.eup %4164  ;;  %3032 = vmatprep.subr.mxu1 %v4163_v24 }
 0xf4a   : > { %4174 = vtanh.f32 %v2722_v27  ;;  %3033 = vmatpush1.msra.mxu1 %v4165_v28 }
 0xf4b   : > { %4176 = vtanh.f32 %v2720_v23  ;;  %3553 = vmatmul.mubr.msk.f32.vlgmr.msra.gmra.mrb[60].mxu1 %vm1040_vm6, %v4697_v40 }
 0xf4c   : > { %v4167_v32 = vpop.eup %4166  ;;  %3167 = vmatprep.mubr.f32.mxu1 %v4257_v21 }
 0xf4d   : > { %v4169_v29 = vpop.eup %4168  ;;  %3103 = vmatprep.subr.mxu1 %v4167_v32 }
 0xf4e   : > { %3104 = vmatpush1.msra.mxu1 %v4169_v29 }
 0xf4f   : > { %3554 = vmatmul.mubr.msk.f32.vlgmr.msra.gmra.mrb[62].mxu1 %vm1040_vm6, %v4697_v40 }
 0xf50   : > { %v4171_v30 = vpop.eup %4170  ;;  %3238 = vmatprep.mubr.f32.mxu1 %v4257_v21 }
 0xf51   : > { %v4173_v36 = vpop.eup %4172  ;;  %3174 = vmatprep.subr.mxu1 %v4171_v30 }
 0xf52   : > { %3175 = vmatpush1.msra.mxu1 %v4173_v36 }
 0xf53   : > { %3555 = vmatmul.mubr.msk.f32.vlgmr.msra.gmra.mrb[64].mxu1 %vm1040_vm6, %v4697_v40 }
 0xf54   : > { %v4175_v31 = vpop.eup %4174  ;;  %3309 = vmatprep.mubr.f32.mxu1 %v4257_v21 }
 0xf55   : > { %v4177_v33 = vpop.eup %4176  ;;  %3245 = vmatprep.subr.mxu1 %v4175_v31 }
 0xf56   : > { %3246 = vmatpush1.msra.mxu1 %v4177_v33 }
 0xf57   : > { %3556 = vmatmul.mubr.msk.f32.vlgmr.msra.gmra.mrb[66].mxu1 %vm1040_vm6, %v4697_v40 }
0x100e   : > { %v2814_v34 = vpop.f32.mrb[52].mxu1 }
0x100f   : > { %v2815_v39 = vadd.f32 %v2814_v34, %v4723_v42  ;;  %v2816_v37 = vpop.f32.mrb[53].mxu1 }
0x1010   : > { %v2817_v38 = vadd.f32 %v2816_v37, %v4723_v42 }
0x1011   : > { %4178 = vtanh.f32 %v2815_v39 }
0x1012   : > { %4180 = vtanh.f32 %v2817_v38  ;;  %v2885_v45 = vpop.f32.mrb[54].mxu1 }
0x1013   : > { %v2886_v21 = vadd.f32 %v2885_v45, %v4723_v42  ;;  %v2887_v46 = vpop.f32.mrb[55].mxu1 }
0x1014   : > { %v2888_v44 = vadd.f32 %v2887_v46, %v4723_v42 }
0x1015   : > { %4182 = vtanh.f32 %v2886_v21 }
0x1016   : > { %4184 = vtanh.f32 %v2888_v44  ;;  %v2956_v40 = vpop.f32.mrb[56].mxu1 }
0x1017   : > { %v2957_v53 = vadd.f32 %v2956_v40, %v4723_v42  ;;  %v2958_v47 = vpop.f32.mrb[57].mxu1 }
0x1018   : > { %v2959_v54 = vadd.f32 %v2958_v47, %v4723_v42 }
0x1019   : > { %4186 = vtanh.f32 %v2957_v53 }
0x101a   : > { %4188 = vtanh.f32 %v2959_v54  ;;  %v3027_v11 = vpop.f32.mrb[58].mxu1 }
0x101b   : > { %v4179_v61 = vpop.eup %4178  ;;  %v3028_v48 = vadd.f32 %v3027_v11, %v4723_v42  ;;  %v3029_v62 = vpop.f32.mrb[59].mxu1 }
0x101c   : > { %v4181_v57 = vpop.eup %4180  ;;  %v3030_v51 = vadd.f32 %v3029_v62, %v4723_v42 }
0x101d   : > { %v3348_v63 = vcombine.low %v4179_v61, %v4181_v57  ;;  %4190 = vtanh.f32 %v3028_v48 }
0x101e   : > { %4192 = vtanh.f32 %v3030_v51  ;;  %v3098_v19 = vpop.f32.mrb[60].mxu1 }
0x101f   : > { %v4183_v58 = vpop.eup %4182  ;;  %3364 = vst [vmem:[%s4736_s22] sm:$0x77] %v3348_v63  ;;  %v3099_v52 = vadd.f32 %v3098_v19, %v4723_v42  ;;  %v3100_v2 = vpop.f32.mrb[61].mxu1 }
0x1020   : > { %v4185_v5 = vpop.eup %4184  ;;  %v3101_v35 = vadd.f32 %v3100_v2, %v4723_v42 }
0x1021   : > { %v3349_v55 = vcombine.low %v4183_v58, %v4185_v5  ;;  %4194 = vtanh.f32 %v3099_v52 }
0x1022   : > { %4196 = vtanh.f32 %v3101_v35  ;;  %v3169_v7 = vpop.f32.mrb[62].mxu1 }
0x1023   : > { %v4187_v3 = vpop.eup %4186  ;;  %3365 = vst [vmem:[%s4736_s22 + $0x8] sm:$0x77] %v3349_v55  ;;  %v3170_v26 = vadd.f32 %v3169_v7, %v4723_v42  ;;  %v3171_v6 = vpop.f32.mrb[63].mxu1 }
0x1024   : > { %v4189_v8 = vpop.eup %4188  ;;  %v3172_v56 = vadd.f32 %v3171_v6, %v4723_v42 }
0x1025   : > { %v3350_v25 = vcombine.low %v4187_v3, %v4189_v8  ;;  %4198 = vtanh.f32 %v3170_v26 }
0x1026   : > { %4200 = vtanh.f32 %v3172_v56  ;;  %v3240_v9 = vpop.f32.mrb[64].mxu1 }
0x1027   : > { %v4191_v1 = vpop.eup %4190  ;;  %3366 = vst [vmem:[%s4736_s22 + $0x10] sm:$0x77] %v3350_v25  ;;  %v3241_v59 = vadd.f32 %v3240_v9, %v4723_v42  ;;  %v3242_v10 = vpop.f32.mrb[65].mxu1 }
0x1028   : > { %v4193_v13 = vpop.eup %4192  ;;  %v3243_v60 = vadd.f32 %v3242_v10, %v4723_v42 }
0x1029   : > { %v3351_v14 = vcombine.low %v4191_v1, %v4193_v13  ;;  %4202 = vtanh.f32 %v3241_v59 }
0x102a   : > { %4204 = vtanh.f32 %v3243_v60  ;;  %v3311_v4 = vpop.f32.mrb[66].mxu1 }
0x102b   : > { %v4195_v15 = vpop.eup %4194  ;;  %3367 = vst [vmem:[%s4736_s22 + $0x18] sm:$0x77] %v3351_v14  ;;  %v3312_v50 = vadd.f32 %v3311_v4, %v4723_v42  ;;  %v3313_v18 = vpop.f32.mrb[67].mxu1 }
0x102c   : > { %v4197_v16 = vpop.eup %4196  ;;  %v3314_v41 = vadd.f32 %v3313_v18, %v4723_v42 }
0x102d   : > { %v3352_v17 = vcombine.low %v4195_v15, %v4197_v16  ;;  %4206 = vtanh.f32 %v3312_v50 }
0x102e   : > { %4208 = vtanh.f32 %v3314_v41 }
0x102f   : > { %v4199_v0 = vpop.eup %4198  ;;  %3368 = vst [vmem:[%s4736_s22 + $0x20] sm:$0x77] %v3352_v17 }
0x1030   : > { %v4201_v20 = vpop.eup %4200 }
0x1031   : > { %v3353_v49 = vcombine.low %v4199_v0, %v4201_v20 }
0x1033   : > { %v4203_v22 = vpop.eup %4202  ;;  %3369 = vst [vmem:[%s4736_s22 + $0x28] sm:$0x77] %v3353_v49 }
0x1034   : > { %v4205_v12 = vpop.eup %4204 }
0x1035   : > { %v3354_v23 = vcombine.low %v4203_v22, %v4205_v12 }
0x1037   : > { %v4207_v43 = vpop.eup %4206  ;;  %3370 = vst [vmem:[%s4736_s22 + $0x30] sm:$0x77] %v3354_v23 }
0x1038   : > { %v4209_v24 = vpop.eup %4208 }
0x1039   : > { %v3355_v27 = vcombine.low %v4207_v43, %v4209_v24 }
0x103b   : > { %3371 = vst [vmem:[%s4736_s22 + $0x38] sm:$0x77] %v3355_v27 }
0x103c PF: > { %s13_s9 = sadd.s32 1, %s4248_s9  }
0x103d   : > { %p10_p3 = scmp.ge.s32.totalorder %s13_s9, 4  }
0x103f   :  { %12 = sbr.rel (!%p10_p3) target bundleno = 1 (0x1), region = 63 }
0x1046   :  { %3393 = vsyncpa [#allocation3], 1 }
0x1047   :  { %3395 = vsyncpa [#allocation3 + $0x1], 1 }

</bundles_post_ra>
